<compile_context>
chip_gen: v7x
topology: tpu7x:2x2x1
jax: 0.10.0
libtpu: 0.0.40
codegen_flags: <defaults>
</compile_context>

<pallas_src>
import jax
import jax.numpy as jnp
from jax.experimental import pallas as pl
from jax.experimental.pallas import tpu as pltpu

FC1_DIMS = 1024
FC2_DIMS = 512
LOG_STD_MIN = -2.0
LOG_STD_MAX = 2.0


def actor_kernel(x_ref, w1_ref, b1_ref, w2_ref, b2_ref, w3_ref, b3_ref, mu_ref):
    # fc1 + ReLU  (bf16 MXU inputs, f32 accumulation, f32 bias/ReLU)
    x = x_ref[...].astype(jnp.bfloat16)
    h1 = jnp.dot(x, w1_ref[...], preferred_element_type=jnp.float32)
    h1 = jnp.maximum(h1 + b1_ref[...], 0.0)
    # fc2 + ReLU
    h2 = jnp.dot(h1.astype(jnp.bfloat16), w2_ref[...],
                 preferred_element_type=jnp.float32)
    h2 = jnp.maximum(h2 + b2_ref[...], 0.0)
    # fc3 (lane-padded output, no activation)
    mu = jnp.dot(h2.astype(jnp.bfloat16), w3_ref[...],
                 preferred_element_type=jnp.float32)
    mu_ref[...] = (mu + b3_ref[...]).astype(mu_ref.dtype)


def _round_up(v, m):
    return ((v + m - 1) // m) * m


def _pick_tile_b(B):
    for t in (256, 128, 64, 32, 16, 8):
        if B % t == 0:
            return t
    return 8


def actor_forward(state, params, *, tile_b=None):
    """state: (B, input_dims) f32. Returns (mu, std) of the policy Normal."""
    B, D = state.shape
    A = params["b3"].shape[-1]

    if tile_b is None:
        tile_b = _pick_tile_b(B)
    Bp = _round_up(B, tile_b)                       # pad batch to tile multiple
    D_pad = _round_up(D, 128)                       # lane-dense input tile
    A_pad = _round_up(A, 128)                       # lane-dense output tile

    x = state
    if Bp != B or D_pad != D:
        x = jnp.pad(state, ((0, Bp - B), (0, D_pad - D)))

    w1 = params["w1"]
    if D_pad != D:                                  # zero rows -> no effect on mu
        w1 = jnp.pad(w1, ((0, D_pad - D), (0, 0)))
    w3 = jnp.pad(params["w3"], ((0, 0), (0, A_pad - A)))
    b3 = jnp.pad(params["b3"], ((0, 0), (0, A_pad - A)))
    b1, w2, b2 = params["b1"], params["w2"], params["b2"]

    const = lambda shape: pl.BlockSpec(shape, lambda i: (0,) * len(shape))

    mu_padded = pl.pallas_call(
        actor_kernel,
        out_shape=jax.ShapeDtypeStruct((Bp, A_pad), jnp.float32),
        grid_spec=pltpu.PrefetchScalarGridSpec(
            num_scalar_prefetch=0,
            grid=(Bp // tile_b,),
            in_specs=[
                pl.BlockSpec((tile_b, D_pad), lambda i: (i, 0)),   # activations: tiled
                const((D_pad, FC1_DIMS)),    const((1, FC1_DIMS)),  # weights: resident
                const((FC1_DIMS, FC2_DIMS)), const((1, FC2_DIMS)),
                const((FC2_DIMS, A_pad)),    const((1, A_pad)),
            ],
            out_specs=pl.BlockSpec((tile_b, A_pad), lambda i: (i, 0)),
        ),
        compiler_params=pltpu.CompilerParams(
            dimension_semantics=("parallel",),       # shard batch tiles across TCs
            vmem_limit_bytes=16 << 20,
        ),
    )(x, w1, b1, w2, b2, w3, b3)

    mu = mu_padded[:B, :A]

    # Normal-distribution parameters (mu, std); std is a tiny elementwise op on
    # the (1, A) log_std parameter, done wrapper-side.
    log_std = jnp.clip(params["log_std"], LOG_STD_MIN, LOG_STD_MAX)
    std = jnp.broadcast_to(jnp.exp(log_std + 1e-8), mu.shape)
    # TODO(synk): torch.distributions.Normal object itself has no Pallas
    # equivalent; we return its parameters (mu, std).
    return mu, std


# ------------------------- initialization & reference -------------------------

def xavier_uniform(key, fan_in, fan_out, dtype=jnp.bfloat16):
    # matches nn.init.xavier_uniform_ (gain=1): U(-a, a), a = sqrt(6/(fan_in+fan_out))
    a = jnp.sqrt(6.0 / (fan_in + fan_out))
    w = jax.random.uniform(key, (fan_in, fan_out), jnp.float32, -a, a)
    return w.astype(dtype)          # stored (in, out) for the kernel, bf16 weights


def linear_bias(key, fan_in, fan_out):
    # PyTorch nn.Linear default bias init: U(-1/sqrt(fan_in), 1/sqrt(fan_in))
    bound = 1.0 / jnp.sqrt(jnp.float32(fan_in))
    return jax.random.uniform(key, (1, fan_out), jnp.float32, -bound, bound)


def init_params(key, input_dims, action_space):
    ks = jax.random.split(key, 6)
    return {
        "w1": xavier_uniform(ks[0], input_dims, FC1_DIMS),
        "b1": linear_bias(ks[1], input_dims, FC1_DIMS),
        "w2": xavier_uniform(ks[2], FC1_DIMS, FC2_DIMS),
        "b2": linear_bias(ks[3], FC1_DIMS, FC2_DIMS),
        "w3": xavier_uniform(ks[4], FC2_DIMS, action_space),
        "b3": linear_bias(ks[5], FC2_DIMS, action_space),
        "log_std": jnp.zeros((1, action_space), jnp.float32),  # torch.zeros * std
    }


def reference_forward(state, p):
    """Emulates the kernel's bf16-input / f32-accumulate arithmetic in plain JAX."""
    f32 = jnp.float32
    x = state.astype(jnp.bfloat16).astype(f32)
    w1 = p["w1"].astype(f32)
    w2 = p["w2"].astype(f32)
    w3 = p["w3"].astype(f32)
    h1 = jnp.maximum(x @ w1 + p["b1"], 0.0)
    h1 = h1.astype(jnp.bfloat16).astype(f32)
    h2 = jnp.maximum(h1 @ w2 + p["b2"], 0.0)
    h2 = h2.astype(jnp.bfloat16).astype(f32)
    mu = h2 @ w3 + p["b3"]
    log_std = jnp.clip(p["log_std"], LOG_STD_MIN, LOG_STD_MAX)
    std = jnp.broadcast_to(jnp.exp(log_std + 1e-8), mu.shape)
    return mu, std


if __name__ == "__main__":
    key = jax.random.PRNGKey(0)
    k_params, k_state = jax.random.split(key)

    INPUT_DIMS = 67    # humanoid-walk flattened observation size
    ACTION_DIMS = 21   # humanoid action space
    BATCH = 32
    TILE_B = 8         # small tile so the batch grid (4 steps) is exercised

    params = init_params(k_params, INPUT_DIMS, ACTION_DIMS)
    state = jax.random.normal(k_state, (BATCH, INPUT_DIMS), jnp.float32)

    mu, std = actor_forward(state, params, tile_b=TILE_B)
    mu = jax.block_until_ready(mu)
    std = jax.block_until_ready(std)

    mu_ref, std_ref = reference_forward(state, params)
    assert mu.shape == (BATCH, ACTION_DIMS)
    assert std.shape == (BATCH, ACTION_DIMS)
    assert jnp.allclose(mu, mu_ref, atol=2e-3, rtol=2e-3), "mu mismatch vs reference"
    assert jnp.allclose(std, std_ref, atol=1e-6), "std mismatch vs reference"

    print("KERNEL_OK")
</pallas_src>

<mosaic_0001>
module attributes {stable_mosaic.version = 11 : i64} {
  func.func @actor_kernel(%arg0: i32, %arg1: memref<8x128xf32, #tpu.memory_space<vmem>>, %arg2: memref<128x1024xbf16, #tpu.memory_space<vmem>>, %arg3: memref<1x1024xf32, #tpu.memory_space<vmem>>, %arg4: memref<1024x512xbf16, #tpu.memory_space<vmem>>, %arg5: memref<1x512xf32, #tpu.memory_space<vmem>>, %arg6: memref<512x128xbf16, #tpu.memory_space<vmem>>, %arg7: memref<1x128xf32, #tpu.memory_space<vmem>>, %arg8: memref<8x128xf32, #tpu.memory_space<vmem>>) attributes {dimension_semantics = [#tpu.dimension_semantics<parallel>], iteration_bounds = array<i64: 4>, scalar_prefetch = 0 : i64, scratch_operands = 0 : i64, tpu.core_type = #tpu.core_type<tc>, window_params = [{transform_indices = @transform_0, window_bounds = array<i64: 8, 128>}, {pipeline_mode = #tpu.pipeline_mode<synchronous>, transform_indices = @transform_1, window_bounds = array<i64: 128, 1024>}, {pipeline_mode = #tpu.pipeline_mode<synchronous>, transform_indices = @transform_2, window_bounds = array<i64: 1, 1024>}, {pipeline_mode = #tpu.pipeline_mode<synchronous>, transform_indices = @transform_3, window_bounds = array<i64: 1024, 512>}, {pipeline_mode = #tpu.pipeline_mode<synchronous>, transform_indices = @transform_4, window_bounds = array<i64: 1, 512>}, {pipeline_mode = #tpu.pipeline_mode<synchronous>, transform_indices = @transform_5, window_bounds = array<i64: 512, 128>}, {pipeline_mode = #tpu.pipeline_mode<synchronous>, transform_indices = @transform_6, window_bounds = array<i64: 1, 128>}, {transform_indices = @transform_7, window_bounds = array<i64: 8, 128>}]} {
    %c0 = arith.constant 0 : index
    %c0_0 = arith.constant 0 : index
    %0 = vector.load %arg1[%c0, %c0_0] : memref<8x128xf32, #tpu.memory_space<vmem>>, vector<8x128xf32>
    %1 = arith.truncf %0 : vector<8x128xf32> to vector<8x128xbf16>
    %c0_1 = arith.constant 0 : index
    %c0_2 = arith.constant 0 : index
    %2 = vector.load %arg2[%c0_1, %c0_2] : memref<128x1024xbf16, #tpu.memory_space<vmem>>, vector<128x1024xbf16>
    %cst = arith.constant dense<0.000000e+00> : vector<8x1024xf32>
    %3 = tpu.matmul %1, %2, %cst {dimension_numbers = #tpu.dot_dimension_numbers<[1], [0], [0], [1], [0, 0, 1, 1], [], []>} : vector<8x128xbf16>, vector<128x1024xbf16>, vector<8x1024xf32> -> vector<8x1024xf32>
    %c0_3 = arith.constant 0 : index
    %c0_4 = arith.constant 0 : index
    %4 = vector.load %arg3[%c0_3, %c0_4] : memref<1x1024xf32, #tpu.memory_space<vmem>>, vector<1x1024xf32>
    %5 = vector.broadcast %4 : vector<1x1024xf32> to vector<8x1024xf32>
    %6 = arith.addf %3, %5 : vector<8x1024xf32>
    %cst_5 = arith.constant 0.000000e+00 : f32
    %7 = vector.broadcast %cst_5 : f32 to vector<8x1024xf32>
    %8 = arith.maximumf %6, %7 : vector<8x1024xf32>
    %9 = arith.truncf %8 : vector<8x1024xf32> to vector<8x1024xbf16>
    %c0_6 = arith.constant 0 : index
    %c0_7 = arith.constant 0 : index
    %10 = vector.load %arg4[%c0_6, %c0_7] : memref<1024x512xbf16, #tpu.memory_space<vmem>>, vector<1024x512xbf16>
    %cst_8 = arith.constant dense<0.000000e+00> : vector<8x512xf32>
    %11 = tpu.matmul %9, %10, %cst_8 {dimension_numbers = #tpu.dot_dimension_numbers<[1], [0], [0], [1], [0, 0, 1, 1], [], []>} : vector<8x1024xbf16>, vector<1024x512xbf16>, vector<8x512xf32> -> vector<8x512xf32>
    %c0_9 = arith.constant 0 : index
    %c0_10 = arith.constant 0 : index
    %12 = vector.load %arg5[%c0_9, %c0_10] : memref<1x512xf32, #tpu.memory_space<vmem>>, vector<1x512xf32>
    %13 = vector.broadcast %12 : vector<1x512xf32> to vector<8x512xf32>
    %14 = arith.addf %11, %13 : vector<8x512xf32>
    %cst_11 = arith.constant 0.000000e+00 : f32
    %15 = vector.broadcast %cst_11 : f32 to vector<8x512xf32>
    %16 = arith.maximumf %14, %15 : vector<8x512xf32>
    %17 = arith.truncf %16 : vector<8x512xf32> to vector<8x512xbf16>
    %c0_12 = arith.constant 0 : index
    %c0_13 = arith.constant 0 : index
    %18 = vector.load %arg6[%c0_12, %c0_13] : memref<512x128xbf16, #tpu.memory_space<vmem>>, vector<512x128xbf16>
    %cst_14 = arith.constant dense<0.000000e+00> : vector<8x128xf32>
    %19 = tpu.matmul %17, %18, %cst_14 {dimension_numbers = #tpu.dot_dimension_numbers<[1], [0], [0], [1], [0, 0, 1, 1], [], []>} : vector<8x512xbf16>, vector<512x128xbf16>, vector<8x128xf32> -> vector<8x128xf32>
    %c0_15 = arith.constant 0 : index
    %c0_16 = arith.constant 0 : index
    %20 = vector.load %arg7[%c0_15, %c0_16] : memref<1x128xf32, #tpu.memory_space<vmem>>, vector<1x128xf32>
    %21 = vector.broadcast %20 : vector<1x128xf32> to vector<8x128xf32>
    %22 = arith.addf %19, %21 : vector<8x128xf32>
    %c0_17 = arith.constant 0 : index
    %c0_18 = arith.constant 0 : index
    %23 = vector.load %arg8[%c0_17, %c0_18] : memref<8x128xf32, #tpu.memory_space<vmem>>, vector<8x128xf32>
    tpu.vector_store %arg8[%c0_17, %c0_18], %22 {strides = array<i32>} : memref<8x128xf32, #tpu.memory_space<vmem>>, vector<8x128xf32>,
    return
  }
  func.func @transform_0(%arg0: i32) -> (i32, i32) {
    %c0_i32 = arith.constant 0 : i32
    %c0_i32_0 = arith.constant 0 : i32
    return %arg0, %c0_i32 : i32, i32
  }
  func.func @transform_1(%arg0: i32) -> (i32, i32) {
    %c0_i32 = arith.constant 0 : i32
    %c0_i32_0 = arith.constant 0 : i32
    %c0_i32_1 = arith.constant 0 : i32
    return %c0_i32, %c0_i32_0 : i32, i32
  }
  func.func @transform_2(%arg0: i32) -> (i32, i32) {
    %c0_i32 = arith.constant 0 : i32
    %c0_i32_0 = arith.constant 0 : i32
    %c0_i32_1 = arith.constant 0 : i32
    return %c0_i32, %c0_i32_0 : i32, i32
  }
  func.func @transform_3(%arg0: i32) -> (i32, i32) {
    %c0_i32 = arith.constant 0 : i32
    %c0_i32_0 = arith.constant 0 : i32
    %c0_i32_1 = arith.constant 0 : i32
    return %c0_i32, %c0_i32_0 : i32, i32
  }
  func.func @transform_4(%arg0: i32) -> (i32, i32) {
    %c0_i32 = arith.constant 0 : i32
    %c0_i32_0 = arith.constant 0 : i32
    %c0_i32_1 = arith.constant 0 : i32
    return %c0_i32, %c0_i32_0 : i32, i32
  }
  func.func @transform_5(%arg0: i32) -> (i32, i32) {
    %c0_i32 = arith.constant 0 : i32
    %c0_i32_0 = arith.constant 0 : i32
    %c0_i32_1 = arith.constant 0 : i32
    return %c0_i32, %c0_i32_0 : i32, i32
  }
  func.func @transform_6(%arg0: i32) -> (i32, i32) {
    %c0_i32 = arith.constant 0 : i32
    %c0_i32_0 = arith.constant 0 : i32
    %c0_i32_1 = arith.constant 0 : i32
    return %c0_i32, %c0_i32_0 : i32, i32
  }
  func.func @transform_7(%arg0: i32) -> (i32, i32) {
    %c0_i32 = arith.constant 0 : i32
    %c0_i32_0 = arith.constant 0 : i32
    return %arg0, %c0_i32 : i32, i32
  }
}

</mosaic_0001>

<bundles_post_ra>
// kernel: tpu_custom_call.1
= control target key start
LH: loop header
LB: loop body
LE: loop exit
PB: predicated region body
PF: predicated region fallthrough
CT: control target
= control target key end

     0   :  { %12 = vsyncpa [#allocation3], 0  ;;  %s4893_s0 = inlined_call_operand.hbm [shape: f32[32,128], index: 0, kind: input, shape index: {}]   ;;  %s4894_s1 = inlined_call_operand.hbm [shape: bf16[128,1024], index: 1, kind: input, shape index: {}]   ;;  %s4895_s2 = inlined_call_operand.hbm [shape: f32[1,1024], index: 2, kind: input, shape index: {}]   ;;  %s4896_s3 = inlined_call_operand.hbm [shape: bf16[1024,512], index: 3, kind: input, shape index: {}]   ;;  %s4897_s4 = inlined_call_operand.vmem [shape: f32[1,512], index: 4, kind: input, shape index: {}]   ;;  %s4898_s5 = inlined_call_operand.hbm [shape: bf16[512,128], index: 5, kind: input, shape index: {}]   ;;  %s4899_s6 = inlined_call_operand.vmem [shape: f32[1,128], index: 6, kind: input, shape index: {}]   ;;  %s4900_s7 = inlined_call_operand.hbm [shape: f32[32,128], index: 7, kind: output, shape index: {}]  }
   0x1   :  { %14 = vsyncpa [#allocation3 + $0x1], 0 }
   0x2   :  { %15 = vsyncpa [#allocation6], 0 }
   0x3   :  { %16 = vsyncpa [#allocation9], 0 }
   0x4   :  { %17 = vsyncpa [#allocation4], 0 }
   0x5   :  { %19 = vsyncpa [#allocation4 + $0x1], 0  ;;  %s4545_s24 = smov 0   ;;  %s4547_s25 = smov 0  }
   0x6   :  { %s4549_s26 = smov 0   ;;  %s4551_s27 = smov 0  }
   0x7 LB: > { %s4492_s28 = smov [#allocation5]   ;;  %s4566_s30 = sadd.s32 4294967295, %s4490_s27   ;;  %s4490_s27 = sphi %s4551_s27, %s4923_s27   ;;  %s4486_s26 = sphi %s4549_s26, %s4922_s26   ;;  %s4482_s25 = sphi %s4547_s25, %s4921_s25   ;;  %s4478_s24 = sphi %s4545_s24, %s4920_s24  }
   0x8   : > { %s220_s29 = sshll.u32 %s4492_s28, 4  ;;  %p3320_p0 = scmp.ge.s32.totalorder %s4490_s27, 1  ;;  %s4571_s29 = int_to_ptr.vmem [resolvable:$true] %s220_s29 }
   0x9   : > { %p4901_p1 = scmp.eq.s32.totalorder %s4566_s30, 0  ;;  %p208_p2 = scmp.lt.s32.totalorder %s4490_s27, 5 }
   0xa   : > { %s4493_s9 = smov [#allocation8]   ;;  %s4494_s12 = smov [#allocation7]  }
   0xb   : > { %p4573_p3 = pnand %p3320_p0, %p208_p2  ;;  %s244_s10 = sshll.u32 %s4493_s9, 4  ;;  %s4585_s10 = int_to_ptr.vmem [resolvable:$true] %s244_s10 }
   0xc   : > { %s4587_s13 = sshll.u32 %s4494_s12, 4  ;;  %s4274_s16 = scalar_lea.hbm %s4894_s1, 8192  ;;  %s235_s13 = int_to_ptr.vmem [resolvable:$true] %s4587_s13 }
   0xd   : > { %s4904_s8 = scalar_select %p4573_p3, 1, 0 }
   0xe   : > { %p3784_p4 = pneg %p4573_p3  ;;  %p4275_p6 = scmp.ne.s32.totalorder %s4894_s1, %s4274_s16 }
   0xf   : > { %p4281_p10 = scmp.lt.u32.totalorder %s4274_s16, %s4894_s1 }
  0x10   : > { %p4581_p5 = pnand %p3784_p4, %p4901_p1 }
  0x12   : > { %p4597_p7 = pneg %p4581_p5 }
  0x14   : > { %p4277_p8 = pnand %p4597_p7, %p4275_p6 }
  0x16   : > { %p4278_p9 = pneg %p4277_p8 }
  0x18   : > { %p4283_p11 = pnand %p4281_p10, %p4278_p9 }
  0x1a   : > { %4286 = shalt.err (!%p4283_p11)
}
  0x1b   : > { %s4287_s22 = scalar_lea.vmem %s4571_s29, 8192  ;;  %p4295_p2 = scmp.lt.s32.totalorder %s4571_s29, %s4571_s29 }
  0x1c   : > { %p4288_p12 = scmp.ne.s32.totalorder %s4571_s29, %s4287_s22  ;;  %p4296_p4 = scmp.lt.s32.totalorder %s4287_s22, %s4287_s22 }
  0x1e   : > { %p4290_p13 = pnand %p4288_p12, %p4597_p7  ;;  %p4297_p6 = por %p4296_p4, %p4295_p2 }
  0x20   : > { %p4291_p0 = pneg %p4290_p13 }
  0x22   : > { %p4298_p8 = pnand %p4297_p6, %p4291_p0 }
  0x24   : > { %4301 = shalt.err (!%p4298_p8)
}
  0x25   : > { %s4495_s23 = smov 512   ;;  %s4496_s28 = smov 32  }
  0x26   : > { %3787 = dma.hbm_to_vmem [thread:$0]  (!%p4581_p5), %s4894_s1, 8192, %s4571_s29, [#allocation6], %s4495_s23, %s4495_s23, %s4496_s28  }
  0x27   : > { %s4302_s16 = scalar_lea.hbm %s4896_s3, 32768 }
  0x28   : > { %p4303_p9 = scmp.ne.s32.totalorder %s4896_s3, %s4302_s16  ;;  %p4309_p12 = scmp.lt.u32.totalorder %s4302_s16, %s4896_s3 }
  0x2a   : > { %p4305_p10 = pnand %p4303_p9, %p4597_p7 }
  0x2c   : > { %p4306_p11 = pneg %p4305_p10 }
  0x2e   : > { %p4311_p13 = pnand %p4309_p12, %p4306_p11 }
  0x30   : > { %4314 = shalt.err (!%p4311_p13)
}
  0x31   : > { %s4315_s29 = scalar_lea.vmem %s4585_s10, 32768  ;;  %p4323_p6 = scmp.lt.s32.totalorder %s4585_s10, %s4585_s10 }
  0x32   : > { %p4316_p0 = scmp.ne.s32.totalorder %s4585_s10, %s4315_s29  ;;  %p4324_p8 = scmp.lt.s32.totalorder %s4315_s29, %s4315_s29 }
  0x34   : > { %p4318_p2 = pnand %p4316_p0, %p4597_p7  ;;  %p4325_p9 = por %p4324_p8, %p4323_p6 }
  0x36   : > { %p4319_p4 = pneg %p4318_p2 }
  0x38   : > { %p4326_p10 = pnand %p4325_p9, %p4319_p4 }
  0x3a   : > { %4329 = shalt.err (!%p4326_p10)
}
  0x3b   : > { %s4497_s22 = smov 256   ;;  %s4498_s23 = smov 16  }
  0x3c   : > { %3793 = dma.hbm_to_vmem [thread:$0]  (!%p4581_p5), %s4896_s3, 32768, %s4585_s10, [#allocation9], %s4497_s22, %s4497_s22, %s4498_s23  }
  0x3d   : > { %s4330_s15 = scalar_lea.hbm %s4895_s2, 128 }
  0x3e   : > { %p4331_p11 = scmp.ne.s32.totalorder %s4895_s2, %s4330_s15  ;;  %p4337_p0 = scmp.lt.u32.totalorder %s4330_s15, %s4895_s2 }
  0x40   : > { %p4333_p12 = pnand %p4331_p11, %p4597_p7 }
  0x42   : > { %p4334_p13 = pneg %p4333_p12 }
  0x44   : > { %p4339_p2 = pnand %p4337_p0, %p4334_p13 }
  0x46   : > { %4342 = shalt.err (!%p4339_p2)
}
  0x47   : > { %s4343_s21 = scalar_lea.vmem %s235_s13, 128  ;;  %p4351_p9 = scmp.lt.s32.totalorder %s235_s13, %s235_s13 }
  0x48   : > { %p4344_p4 = scmp.ne.s32.totalorder %s235_s13, %s4343_s21  ;;  %p4352_p10 = scmp.lt.s32.totalorder %s4343_s21, %s4343_s21 }
  0x4a   : > { %p4346_p6 = pnand %p4344_p4, %p4597_p7  ;;  %p4353_p1 = por %p4352_p10, %p4351_p9 }
  0x4c   : > { %p4347_p8 = pneg %p4346_p6 }
  0x4e   : > { %p4354_p3 = pnand %p4353_p1, %p4347_p8 }
  0x50   : > { %4357 = shalt.err (!%p4354_p3)
}
  0x51   : > { %3790 = dma.hbm_to_vmem [thread:$0]  (!%p4581_p5), %s4895_s2, 128, %s235_s13, [#allocation6]  }
  0x52   : > { %s4499_s22 = smov [#allocation10]   ;;  %s4358_s12 = scalar_lea.hbm %s4898_s5, 4096 }
  0x53   : > { %s260_s23 = sshll.u32 %s4499_s22, 4  ;;  %p4359_p11 = scmp.ne.s32.totalorder %s4898_s5, %s4358_s12  ;;  %s261_s23 = int_to_ptr.vmem [resolvable:$true] %s260_s23 }
  0x54   : > { %p4365_p12 = scmp.lt.u32.totalorder %s4358_s12, %s4898_s5 }
  0x55   : > { %p4361_p1 = pnand %p4359_p11, %p4597_p7 }
  0x57   : > { %p4362_p3 = pneg %p4361_p1 }
  0x59   : > { %p4367_p13 = pnand %p4365_p12, %p4362_p3 }
  0x5b   : > { %4370 = shalt.err (!%p4367_p13)
}
  0x5c   : > { %s4371_s13 = scalar_lea.vmem %s261_s23, 4096  ;;  %p4379_p6 = scmp.lt.s32.totalorder %s261_s23, %s261_s23 }
  0x5d   : > { %p4372_p0 = scmp.ne.s32.totalorder %s261_s23, %s4371_s13  ;;  %p4380_p8 = scmp.lt.s32.totalorder %s4371_s13, %s4371_s13 }
  0x5f   : > { %p4374_p2 = pnand %p4372_p0, %p4597_p7  ;;  %p4381_p9 = por %p4380_p8, %p4379_p6 }
  0x61   : > { %p4375_p4 = pneg %p4374_p2 }
  0x63   : > { %p4382_p10 = pnand %p4381_p9, %p4375_p4 }
  0x65   : > { %4385 = shalt.err (!%p4382_p10)
}
  0x66   : > { %s4500_s18 = smov 64   ;;  %s4501_s19 = smov 4  }
  0x67   : > { %3796 = dma.hbm_to_vmem [thread:$0]  (!%p4581_p5), %s4898_s5, 4096, %s261_s23, [#allocation9], %s4500_s18, %s4500_s18, %s4501_s19  }
  0x68   : > { %s3319_s10 = sadd.s32 4294967294, %s4490_s27   ;;  %s4680_s29 = sadd.s32 1, %s4490_s27  }
  0x69   : > { %s29_s22 = ssub.s32 %s4490_s27, %s4680_s29  ;;  %s32_s28 = sadd.s32 1, %s4486_s26 }
  0x6a   : > { %p30_p7 = scmp.eq.s32.totalorder %s29_s22, 0  ;;  %p39_p11 = scmp.ne.s32.totalorder %s4486_s26, %s4482_s25 }
  0x6b   : > { %p40_p1 = scmp.eq.s32.totalorder %s4490_s27, 0  ;;  %p45_p3 = scmp.ne.s32.totalorder %s4482_s25, %s4478_s24 }
  0x6c   : > { %s4691_s9 = scalar_select %p30_p7, %s4486_s26, %s32_s28  }
  0x6d   : > { %p4693_p12 = por %p40_p1, %p39_p11  ;;  %p4908_p13 = scmp.eq.s32.totalorder %s4566_s30, 0 }
  0x6e   : > { %p195_p0 = scmp.eq.s32.totalorder %s4566_s30, 3  ;;  %p201_p2 = scmp.eq.s32.totalorder %s3319_s10, 3 }
  0x6f   : > { %p4699_p5 = por %p4908_p13, %p45_p3  ;;  %p3809_p4 = scmp.lt.s32.totalorder %s4490_s27, 4 }
  0x70   : > { %s277_s12 = sand.u32 1, %s4486_s26   ;;  %p4706_p6 = por %p195_p0, %p39_p11 }
  0x71   : > { %p4710_p8 = por %p201_p2, %p45_p3  ;;  %s3326_s16 = sshll.u32 %s277_s12, 3 }
  0x72   : > { %s4910_s14 = scalar_select %p4706_p6, 1, 0 }
  0x73   : > { %s4911_s15 = scalar_select %p4710_p8, 1, 0 }
  0x74   : > { %s3327_s17 = sshll.u32 %s4490_s27, 7  ;;  %s281_s20 = scalar_lea.vmem [#allocation2], %s3326_s16 }
  0x75   : > { %s4718_s19 = scalar_lea.hbm %s4893_s0, %s3327_s17  ;;  %s288_s21 = sshll.u32 %s281_s20, 4  ;;  %s4720_s21 = int_to_ptr.vmem [resolvable:$true] %s288_s21 }
  0x76   : > { %p4724_p9 = pnand %p3809_p4, %p4693_p12  ;;  %s278_s22 = scalar_lea.sflag [#allocation3], %s277_s12 }
  0x77   : > { %s4386_s28 = scalar_lea.hbm %s4718_s19, 128  ;;  %s4391_s13 = scalar_lea.hbm %s4893_s0, 512 }
  0x78   : > { %p4387_p10 = scmp.ne.s32.totalorder %s4718_s19, %s4386_s28  ;;  %p4388_p7 = pneg %p4724_p9 }
  0x79   : > { %p4392_p3 = scmp.lt.u32.totalorder %s4718_s19, %s4893_s0  ;;  %p4393_p12 = scmp.lt.u32.totalorder %s4391_s13, %s4386_s28 }
  0x7a   : > { %p4389_p11 = pnand %p4388_p7, %p4387_p10  ;;  %p4395_p0 = scmp.lt.u32.totalorder %s4386_s28, %s4718_s19 }
  0x7b   : > { %p4394_p13 = por %p4393_p12, %p4392_p3 }
  0x7c   : > { %p4390_p1 = pneg %p4389_p11 }
  0x7d   : > { %p4396_p2 = por %p4395_p0, %p4394_p13 }
  0x7f   : > { %p4397_p4 = pnand %p4396_p2, %p4390_p1 }
  0x81   : > { %4400 = shalt.err (!%p4397_p4)
}
  0x82   : > { %s4401_s12 = scalar_lea.vmem %s4720_s21, 128  ;;  %s4502_s20 = smov [#allocation2]  }
  0x83   : > { %p4402_p10 = scmp.ne.s32.totalorder %s4720_s21, %s4401_s12  ;;  %s4406_s16 = sshll.u32 %s4502_s20, 4  ;;  %s4407_s16 = int_to_ptr.vmem [resolvable:$false] %s4406_s16 }
  0x84   : > { %s4408_s17 = scalar_lea.vmem %s4407_s16, 256  ;;  %p4409_p6 = scmp.lt.s32.totalorder %s4720_s21, %s4407_s16 }
  0x85   : > { %p4404_p11 = pnand %p4402_p10, %p4388_p7  ;;  %p4410_p3 = scmp.lt.s32.totalorder %s4408_s17, %s4401_s12 }
  0x87   : > { %p4405_p8 = pneg %p4404_p11  ;;  %p4411_p12 = por %p4410_p3, %p4409_p6 }
  0x89   : > { %p4412_p13 = pnand %p4411_p12, %p4405_p8 }
  0x8b   : > { %4415 = shalt.err (!%p4412_p13)
}
  0x8c   : > { %3800 = dma.hbm_to_vmem [thread:$0]  (!%p4724_p9), %s4718_s19, 128, %s4720_s21, %s278_s22  }
  0x8d   : > { %p4913_p1 = scmp.ne.s32.totalorder %s4904_s8, 0 }
  0x8e   : > { %s4756_s28 = sand.u32 (!%p4913_p1), 1, %s4482_s25  }
  0x8f   : > { %297 = sbr.rel (%p4913_p1) target bundleno = 1058 (0x422), region = 48  ;;  %s3329_s13 = sshll.u32 (!%p4913_p1), %s4756_s28, 3 }
  0x90   : > { %s300_s11 = scalar_lea.sflag (!%p4913_p1), [#allocation3], %s4756_s28  ;;  %s4762_s18 = scalar_lea.vmem (!%p4913_p1), [#allocation2], %s3329_s13 }
  0x96   : > { %4461 = dma.done.wait (%p4699_p5), %s300_s11, 128  }
  0x97   : > { %4463 = vsyncadd (%p4699_p5), %s300_s11, 4294967168  ;;  %p4914_p6 = scmp.eq.s32.totalorder %s4566_s30, 0 }
  0x99   : > { %4465 = dma.done.wait (%p4914_p6), [#allocation6], 8320   ;;  %p4915_p8 = pmov %p4914_p6 }
  0x9a   : > { %p4916_p9 = pmov %p4914_p6 }
  0x9b   : > { %4467 = vsyncadd (%p4915_p8), [#allocation6], 4294958976 }
  0x9c   : > { %4469 = dma.done.wait (%p4916_p9), [#allocation9], 36864   ;;  %p4917_p7 = pmov %p4914_p6 }
  0x9d   : > { %v4503_v0 = vmov 0   ;;  %v353_v1 = vld [vmem:[#allocation5] sm:$0xff]  ;;  %v354_v14 = vld [vmem:[#allocation5 + $0x8] sm:$0xff]  ;;  %v351_v57 = vld [vmem:[%s4762_s18] sm:$0xff]  ;;  %s3689_s10 = sshll.u32 %s4566_s30, 7  ;;  %s349_s22 = scalar_lea.vmem [#allocation11], %s3329_s13 }
  0x9e   : > { %4471 = vsyncadd (%p4917_p7), [#allocation9], 4294930432  ;;  %811 = vmatprep.mubr.bf16.mxu0 %v4503_v0  ;;  %852 = vmatprep.mubr.bf16.mxu1 %v4503_v0  ;;  %v357_v2 = vld [vmem:[#allocation5 + $0x20] sm:$0xff]  ;;  %v358_v15 = vld [vmem:[#allocation5 + $0x28] sm:$0xff]  ;;  %s3211_s12 = sshll.u32 %s349_s22, 4  ;;  %s4850_s17 = scalar_lea.hbm %s4900_s7, %s3689_s10  ;;  %s4852_s12 = int_to_ptr.vmem [resolvable:$true] %s3211_s12 }
  0x9f   : > { %v361_v3 = vld [vmem:[#allocation5 + $0x40] sm:$0xff]  ;;  %v3336_v4 = vcombine.high %v353_v1, %v357_v2  ;;  %v3335_v5 = vcombine.low %v353_v1, %v357_v2  ;;  %v362_v16 = vld [vmem:[#allocation5 + $0x48] sm:$0xff]  ;;  %v3338_v18 = vcombine.high %v354_v14, %v358_v15  ;;  %v3337_v19 = vcombine.low %v354_v14, %v358_v15  ;;  %v355_v59 = vld [vmem:[#allocation5 + $0x10] sm:$0xff]  ;;  %s3198_s11 = scalar_lea.sflag [#allocation4], %s4756_s28  ;;  %s4416_s18 = scalar_lea.vmem %s4852_s12, 128 }
  0xa0   : > { %v365_v6 = vld [vmem:[#allocation5 + $0x60] sm:$0xff]  ;;  %v366_v17 = vld [vmem:[#allocation5 + $0x68] sm:$0xff]  ;;  %v359_v60 = vld [vmem:[#allocation5 + $0x30] sm:$0xff]  ;;  %p4417_p5 = scmp.ne.s32.totalorder %s4852_s12, %s4416_s18  ;;  %p4918_p0 = scmp.ne.s32.totalorder %s4910_s14, 0 }
  0xa1   : > { %v3344_v7 = vcombine.high %v361_v3, %v365_v6  ;;  %v369_v8 = vld [vmem:[#allocation5 + $0x80] sm:$0xff]  ;;  %779 = vmatprep.subr.bf16.mxu0 %v3336_v4  ;;  %v3343_v10 = vcombine.low %v361_v3, %v365_v6  ;;  %v3346_v20 = vcombine.high %v362_v16, %v366_v17  ;;  %v370_v22 = vld [vmem:[#allocation5 + $0x88] sm:$0xff]  ;;  %820 = vmatprep.subr.bf16.mxu1 %v3338_v18  ;;  %v363_v4 = vld [vmem:[#allocation5 + $0x50] sm:$0xff]  ;;  %s4504_s30 = smov [#allocation11]  }
  0xa2   : > { %v373_v9 = vld [vmem:[#allocation5 + $0xa0] sm:$0xff]  ;;  %780 = vmatpush1.bf16.msra.mxu0 %v3335_v5  ;;  %v374_v23 = vld [vmem:[#allocation5 + $0xa8] sm:$0xff]  ;;  %821 = vmatpush1.bf16.msra.mxu1 %v3337_v19  ;;  %v3345_v27 = vcombine.low %v362_v16, %v366_v17  ;;  %v3340_v2 = vcombine.high %v355_v59, %v359_v60  ;;  %v367_v5 = vld [vmem:[#allocation5 + $0x70] sm:$0xff]  ;;  %v4779_v6 = vpack.c.bf16 %v351_v57, %v351_v57  ;;  %p4418_p2 = pnand %p4417_p5, %p4918_p0  ;;  %s4420_s13 = sshll.u32 %s4504_s30, 4  ;;  %s4421_s13 = int_to_ptr.vmem [resolvable:$false] %s4420_s13 }
  0xa3   : > { %781 = vmatprep.subr.bf16.mxu0 %v3344_v7  ;;  %v3352_v11 = vcombine.high %v369_v8, %v373_v9  ;;  %v377_v12 = vld [vmem:[#allocation5 + $0xc0] sm:$0xff]  ;;  %v3351_v21 = vcombine.low %v369_v8, %v373_v9  ;;  %822 = vmatprep.subr.bf16.mxu1 %v3346_v20  ;;  %v3354_v28 = vcombine.high %v370_v22, %v374_v23  ;;  %v378_v30 = vld [vmem:[#allocation5 + $0xc8] sm:$0xff]  ;;  %v356_v8 = vld [vmem:[#allocation5 + $0x18] sm:$0xff]  ;;  %s4422_s8 = scalar_lea.vmem %s4421_s13, 256  ;;  %p4423_p10 = scmp.lt.s32.totalorder %s4852_s12, %s4421_s13 }
  0xa4   : > { %v381_v13 = vld [vmem:[#allocation5 + $0xe0] sm:$0xff]  ;;  %v382_v31 = vld [vmem:[#allocation5 + $0xe8] sm:$0xff]  ;;  %v3353_v35 = vcombine.low %v370_v22, %v374_v23  ;;  %v3339_v9 = vcombine.low %v355_v59, %v359_v60  ;;  %v375_v14 = vld [vmem:[#allocation5 + $0xb0] sm:$0xff]  ;;  %v3347_v17 = vcombine.low %v363_v4, %v367_v5  ;;  %p4419_p4 = pneg %p4418_p2  ;;  %p4424_p11 = scmp.lt.s32.totalorder %s4422_s8, %s4416_s18 }
  0xa5   : > { %v3360_v24 = vcombine.high %v377_v12, %v381_v13  ;;  %v385_v25 = vld [vmem:[#allocation5 + $0x100] sm:$0xff]  ;;  %v3359_v29 = vcombine.low %v377_v12, %v381_v13  ;;  %v3362_v36 = vcombine.high %v378_v30, %v382_v31  ;;  %v386_v38 = vld [vmem:[#allocation5 + $0x108] sm:$0xff]  ;;  %v3361_v43 = vcombine.low %v378_v30, %v382_v31  ;;  %v371_v13 = vld [vmem:[#allocation5 + $0x90] sm:$0xff] }
  0xa6   : > { %782 = vmatpush1.bf16.msra.mxu0 %v3343_v10  ;;  %v389_v26 = vld [vmem:[#allocation5 + $0x120] sm:$0xff]  ;;  %823 = vmatpush1.bf16.msra.mxu1 %v3345_v27  ;;  %v390_v39 = vld [vmem:[#allocation5 + $0x128] sm:$0xff]  ;;  %v360_v10 = vld [vmem:[#allocation5 + $0x38] sm:$0xff]  ;;  %v3356_v19 = vcombine.high %v371_v13, %v375_v14  ;;  %p4425_p3 = por %p4424_p11, %p4423_p10 }
  0xa7   : > { %783 = vmatprep.subr.bf16.mxu0 %v3352_v11  ;;  %v3368_v32 = vcombine.high %v385_v25, %v389_v26  ;;  %v393_v33 = vld [vmem:[#allocation5 + $0x140] sm:$0xff]  ;;  %824 = vmatprep.subr.bf16.mxu1 %v3354_v28  ;;  %v3367_v37 = vcombine.low %v385_v25, %v389_v26  ;;  %v3370_v44 = vcombine.high %v386_v38, %v390_v39  ;;  %v394_v46 = vld [vmem:[#allocation5 + $0x148] sm:$0xff]  ;;  %v364_v16 = vld [vmem:[#allocation5 + $0x58] sm:$0xff] }
  0xa8   : > { %v397_v34 = vld [vmem:[#allocation5 + $0x160] sm:$0xff]  ;;  %v398_v47 = vld [vmem:[#allocation5 + $0x168] sm:$0xff]  ;;  %v3369_v51 = vcombine.low %v386_v38, %v390_v39  ;;  %v3348_v11 = vcombine.high %v363_v4, %v367_v5  ;;  %v3342_v15 = vcombine.high %v356_v8, %v360_v10  ;;  %v368_v18 = vld [vmem:[#allocation5 + $0x78] sm:$0xff]  ;;  %v3341_v22 = vcombine.low %v356_v8, %v360_v10  ;;  %p4426_p12 = pnand %p4425_p3, %p4419_p4 }
  0xa9   : > { %v3376_v40 = vcombine.high %v393_v33, %v397_v34  ;;  %v401_v41 = vld [vmem:[#allocation5 + $0x180] sm:$0xff]  ;;  %v3375_v45 = vcombine.low %v393_v33, %v397_v34  ;;  %v3378_v52 = vcombine.high %v394_v46, %v398_v47  ;;  %v402_v53 = vld [vmem:[#allocation5 + $0x188] sm:$0xff]  ;;  %v3377_v58 = vcombine.low %v394_v46, %v398_v47  ;;  %v379_v20 = vld [vmem:[#allocation5 + $0xd0] sm:$0xff] }
  0xaa   : > { %784 = vmatpush1.bf16.msra.mxu0 %v3351_v21  ;;  %v405_v42 = vld [vmem:[#allocation5 + $0x1a0] sm:$0xff]  ;;  %825 = vmatpush1.bf16.msra.mxu1 %v3353_v35  ;;  %v406_v55 = vld [vmem:[#allocation5 + $0x1a8] sm:$0xff]  ;;  %v383_v21 = vld [vmem:[#allocation5 + $0xf0] sm:$0xff]  ;;  %v3350_v23 = vcombine.high %v364_v16, %v368_v18  ;;  %v3355_v25 = vcombine.low %v371_v13, %v375_v14  ;;  %v3349_v30 = vcombine.low %v364_v16, %v368_v18 }
  0xab   : > { %785 = vmatprep.subr.bf16.mxu0 %v3360_v24  ;;  %826 = vmatprep.subr.bf16.mxu1 %v3362_v36  ;;  %v3384_v48 = vcombine.high %v401_v41, %v405_v42  ;;  %v409_v49 = vld [vmem:[#allocation5 + $0x1c0] sm:$0xff]  ;;  %v3383_v54 = vcombine.low %v401_v41, %v405_v42  ;;  %v3386_v61 = vcombine.high %v402_v53, %v406_v55  ;;  %v410_v62 = vld [vmem:[#allocation5 + $0x1c8] sm:$0xff]  ;;  %v372_v24 = vld [vmem:[#allocation5 + $0x98] sm:$0xff] }
  0xac   : > { %v413_v50 = vld [vmem:[#allocation5 + $0x1e0] sm:$0xff]  ;;  %v414_v1 = vld [vmem:[#allocation5 + $0x1e8] sm:$0xff]  ;;  %v3385_v3 = vcombine.low %v402_v53, %v406_v55  ;;  %v376_v26 = vld [vmem:[#allocation5 + $0xb8] sm:$0xff]  ;;  %v3364_v27 = vcombine.high %v379_v20, %v383_v21  ;;  %v3363_v33 = vcombine.low %v379_v20, %v383_v21 }
  0xad   : > { %v3392_v56 = vcombine.high %v409_v49, %v413_v50  ;;  %v3391_v63 = vcombine.low %v409_v49, %v413_v50  ;;  %v3394_v7 = vcombine.high %v410_v62, %v414_v1  ;;  %v3393_v12 = vcombine.low %v410_v62, %v414_v1  ;;  %v387_v28 = vld [vmem:[#allocation5 + $0x110] sm:$0xff]  ;;  %v384_v34 = vld [vmem:[#allocation5 + $0xf8] sm:$0xff] }
  0xae   : > { %786 = vmatpush1.bf16.msra.mxu0 %v3359_v29  ;;  %827 = vmatpush1.bf16.msra.mxu1 %v3361_v43  ;;  %v391_v29 = vld [vmem:[#allocation5 + $0x130] sm:$0xff]  ;;  %v3358_v31 = vcombine.high %v372_v24, %v376_v26  ;;  %v3357_v38 = vcombine.low %v372_v24, %v376_v26  ;;  %v392_v42 = vld [vmem:[#allocation5 + $0x138] sm:$0xff] }
  0xaf   : > { %787 = vmatprep.subr.bf16.mxu0 %v3368_v32  ;;  %828 = vmatprep.subr.bf16.mxu1 %v3370_v44  ;;  %v380_v32 = vld [vmem:[#allocation5 + $0xd8] sm:$0xff]  ;;  %v3372_v35 = vcombine.high %v387_v28, %v391_v29  ;;  %v395_v36 = vld [vmem:[#allocation5 + $0x150] sm:$0xff]  ;;  %v3371_v41 = vcombine.low %v387_v28, %v391_v29 }
  0xb0   : > { %v3366_v39 = vcombine.high %v380_v32, %v384_v34  ;;  %v403_v43 = vld [vmem:[#allocation5 + $0x190] sm:$0xff]  ;;  %v396_v47 = vld [vmem:[#allocation5 + $0x158] sm:$0xff] }
  0xb1   : > { %v407_v44 = vld [vmem:[#allocation5 + $0x1b0] sm:$0xff]  ;;  %v400_v49 = vld [vmem:[#allocation5 + $0x178] sm:$0xff] }
  0xb2   : > { %788 = vmatpush1.bf16.msra.mxu0 %v3367_v37  ;;  %829 = vmatpush1.bf16.msra.mxu1 %v3369_v51  ;;  %v399_v37 = vld [vmem:[#allocation5 + $0x170] sm:$0xff]  ;;  %v3388_v50 = vcombine.high %v403_v43, %v407_v44  ;;  %v404_v55 = vld [vmem:[#allocation5 + $0x198] sm:$0xff]  ;;  %v3381_v59 = vcombine.low %v396_v47, %v400_v49 }
  0xb3   : > { %789 = vmatprep.subr.bf16.mxu0 %v3376_v40  ;;  %830 = vmatprep.subr.bf16.mxu1 %v3378_v52  ;;  %v388_v40 = vld [vmem:[#allocation5 + $0x118] sm:$0xff]  ;;  %v411_v51 = vld [vmem:[#allocation5 + $0x1d0] sm:$0xff] }
  0xb4   : > { %v3374_v46 = vcombine.high %v388_v40, %v392_v42  ;;  %v415_v52 = vld [vmem:[#allocation5 + $0x1f0] sm:$0xff]  ;;  %v3373_v53 = vcombine.low %v388_v40, %v392_v42  ;;  %v408_v57 = vld [vmem:[#allocation5 + $0x1b8] sm:$0xff] }
  0xb5   : > { %v412_v60 = vld [vmem:[#allocation5 + $0x1d8] sm:$0xff]  ;;  %v3390_v62 = vcombine.high %v404_v55, %v408_v57  ;;  %v3395_v1 = vcombine.low %v411_v51, %v415_v52  ;;  %v3875_v16 = vld [vmem:[#allocation8 + $0x4c] ss:$16 sps:$4 sm:$0xff]   ;;  %v3885_v26 = vld [vmem:[#allocation8 + $0x88] ss:$16 sps:$4 sm:$0xff]  }
  0xb6   : > { %790 = vmatpush1.bf16.msra.mxu0 %v3375_v45  ;;  %831 = vmatpush1.bf16.msra.mxu1 %v3377_v58  ;;  %v3365_v45 = vcombine.low %v380_v32, %v384_v34  ;;  %v3396_v58 = vcombine.high %v411_v51, %v415_v52  ;;  %v3866_v5 = vld [vmem:[#allocation8 + $0x24] ss:$16 sps:$4 sm:$0xff]   ;;  %v3870_v13 = vld [vmem:[#allocation8 + $0x40] ss:$16 sps:$4 sm:$0xff]   ;;  %v3881_v20 = vld [vmem:[#allocation8 + $0x6c] ss:$16 sps:$4 sm:$0xff]  }
  0xb7   : > { %791 = vmatprep.subr.bf16.mxu0 %v3384_v48  ;;  %832 = vmatprep.subr.bf16.mxu1 %v3386_v61  ;;  %v3379_v48 = vcombine.low %v395_v36, %v399_v37  ;;  %v416_v61 = vld [vmem:[#allocation5 + $0x1f8] sm:$0xff]  ;;  %v3887_v24 = vld [vmem:[#allocation8 + $0x8c] ss:$16 sps:$4 sm:$0xff]   ;;  %v3897_v34 = vld [vmem:[#allocation8 + $0xc8] ss:$16 sps:$4 sm:$0xff]  }
  0xb8   : > { %v3398_v4 = vcombine.high %v412_v60, %v416_v61  ;;  %v3397_v8 = vcombine.low %v412_v60, %v416_v61  ;;  %v3872_v10 = vld [vmem:[#allocation8 + $0x44] ss:$16 sps:$4 sm:$0xff]   ;;  %v3882_v21 = vld [vmem:[#allocation8 + $0x80] ss:$16 sps:$4 sm:$0xff]   ;;  %v3909_v42 = vld [vmem:[#allocation8 + $0x108] ss:$16 sps:$4 sm:$0xff]  }
  0xb9   : > { %v3878_v14 = vld [vmem:[#allocation8 + $0x64] ss:$16 sps:$4 sm:$0xff]   ;;  %v3894_v28 = vld [vmem:[#allocation8 + $0xc0] ss:$16 sps:$4 sm:$0xff]   ;;  %v3947_v61 = vld [vmem:[#allocation8 + $0x1cc] ss:$16 sps:$4 sm:$0xff]  }
  0xba   : > { %792 = vmatpush1.bf16.msra.mxu0 %v3383_v54  ;;  %833 = vmatpush1.bf16.msra.mxu1 %v3385_v3  ;;  %v3382_v54 = vcombine.high %v396_v47, %v400_v49  ;;  %v3858_v3 = vld [vmem:[#allocation8] ss:$16 sps:$4 sm:$0xff]   ;;  %v3884_v18 = vld [vmem:[#allocation8 + $0x84] ss:$16 sps:$4 sm:$0xff]   ;;  %v3921_v49 = vld [vmem:[#allocation8 + $0x148] ss:$16 sps:$4 sm:$0xff]  }
  0xbb   : > { %793 = vmatprep.subr.bf16.mxu0 %v3392_v56  ;;  %834 = vmatprep.subr.bf16.mxu1 %v3394_v7  ;;  %v3387_v56 = vcombine.low %v403_v43, %v407_v44  ;;  %v3863_v7 = vld [vmem:[#allocation8 + $0xc] ss:$16 sps:$4 sm:$0xff]   ;;  %v3902_v29 = vld [vmem:[#allocation8 + $0xe4] ss:$16 sps:$4 sm:$0xff]   ;;  %v3900_v32 = vld [vmem:[#allocation8 + $0xe0] ss:$16 sps:$4 sm:$0xff]  }
  0xbc   : > { %v3912_v40 = vld [vmem:[#allocation8 + $0x120] ss:$16 sps:$4 sm:$0xff]   ;;  %v3926_v44 = vld [vmem:[#allocation8 + $0x164] ss:$16 sps:$4 sm:$0xff]  }
  0xbd   : > { %v3918_v43 = vld [vmem:[#allocation8 + $0x140] ss:$16 sps:$4 sm:$0xff]   ;;  %v3938_v52 = vld [vmem:[#allocation8 + $0x1a4] ss:$16 sps:$4 sm:$0xff]  }
  0xbe   : > { %794 = vmatpush1.bf16.msra.mxu0 %v3391_v63  ;;  %835 = vmatpush1.bf16.msra.mxu1 %v3393_v12  ;;  %v3860_v63 = vld [vmem:[#allocation8 + $0x4] ss:$16 sps:$4 sm:$0xff]   ;;  %v3869_v12 = vld [vmem:[#allocation8 + $0x2c] ss:$16 sps:$4 sm:$0xff]   ;;  %v3924_v47 = vld [vmem:[#allocation8 + $0x160] ss:$16 sps:$4 sm:$0xff]  }
  0xbf   : > { %861 = vmatprep.subr.bf16.mxu0 %v3340_v2  ;;  %902 = vmatprep.subr.bf16.mxu1 %v3342_v15  ;;  %v3389_v2 = vcombine.low %v404_v55, %v408_v57  ;;  %v3867_v15 = vld [vmem:[#allocation8 + $0x28] ss:$16 sps:$4 sm:$0xff]   ;;  %v3930_v51 = vld [vmem:[#allocation8 + $0x180] ss:$16 sps:$4 sm:$0xff]   ;;  %v3941_v57 = vld [vmem:[#allocation8 + $0x1ac] ss:$16 sps:$4 sm:$0xff]  }
  0xc0   : > { %v3933_v55 = vld [vmem:[#allocation8 + $0x188] ss:$16 sps:$4 sm:$0xff]   ;;  %v3942_v60 = vld [vmem:[#allocation8 + $0x1c0] ss:$16 sps:$4 sm:$0xff]  }
  0xc1   : > { %812 = vmatmul.mubr.bf16.vlgmr.msra.gmra.mrb[0].mxu0 %v4779_v6  ;;  %853 = vmatmul.mubr.bf16.vlgmr.msra.gmra.mrb[0].mxu1 %v4779_v6 }
  0xc2   : > { %862 = vmatpush1.bf16.msra.mxu0 %v3339_v9  ;;  %893 = vmatprep.mubr.bf16.mxu0 %v4503_v0  ;;  %v3864_v9 = vld [vmem:[#allocation8 + $0x20] ss:$16 sps:$4 sm:$0xff]  }
  0xc3   : > { %863 = vmatprep.subr.bf16.mxu0 %v3348_v11  ;;  %903 = vmatpush1.bf16.msra.mxu1 %v3341_v22  ;;  %v3861_v11 = vld [vmem:[#allocation8 + $0x8] ss:$16 sps:$4 sm:$0xff]   ;;  %v3890_v22 = vld [vmem:[#allocation8 + $0xa4] ss:$16 sps:$4 sm:$0xff]  }
  0xc4   : > { %934 = vmatprep.mubr.bf16.mxu1 %v4503_v0  ;;  %904 = vmatprep.subr.bf16.mxu1 %v3350_v23  ;;  %v3380_v0 = vcombine.high %v395_v36, %v399_v37  ;;  %v3879_v23 = vld [vmem:[#allocation8 + $0x68] ss:$16 sps:$4 sm:$0xff]   ;;  %v3906_v36 = vld [vmem:[#allocation8 + $0x100] ss:$16 sps:$4 sm:$0xff]   ;;  %v3914_v37 = vld [vmem:[#allocation8 + $0x124] ss:$16 sps:$4 sm:$0xff]  }
  0xc6   : > { %864 = vmatpush1.bf16.msra.mxu0 %v3347_v17  ;;  %v3876_v17 = vld [vmem:[#allocation8 + $0x60] ss:$16 sps:$4 sm:$0xff]  }
  0xc7   : > { %865 = vmatprep.subr.bf16.mxu0 %v3356_v19  ;;  %905 = vmatpush1.bf16.msra.mxu1 %v3349_v30  ;;  %v3873_v19 = vld [vmem:[#allocation8 + $0x48] ss:$16 sps:$4 sm:$0xff]  }
  0xc8   : > { %906 = vmatprep.subr.bf16.mxu1 %v3358_v31  ;;  %v3891_v30 = vld [vmem:[#allocation8 + $0xa8] ss:$16 sps:$4 sm:$0xff]   ;;  %v3899_v31 = vld [vmem:[#allocation8 + $0xcc] ss:$16 sps:$4 sm:$0xff]  }
  0xca   : > { %866 = vmatpush1.bf16.msra.mxu0 %v3355_v25  ;;  %v3896_v25 = vld [vmem:[#allocation8 + $0xc4] ss:$16 sps:$4 sm:$0xff]  }
  0xcb   : > { %867 = vmatprep.subr.bf16.mxu0 %v3364_v27  ;;  %907 = vmatpush1.bf16.msra.mxu1 %v3357_v38  ;;  %v3893_v27 = vld [vmem:[#allocation8 + $0xac] ss:$16 sps:$4 sm:$0xff]   ;;  %v3903_v38 = vld [vmem:[#allocation8 + $0xe8] ss:$16 sps:$4 sm:$0xff]  }
  0xcc   : > { %908 = vmatprep.subr.bf16.mxu1 %v3366_v39  ;;  %v3911_v39 = vld [vmem:[#allocation8 + $0x10c] ss:$16 sps:$4 sm:$0xff]  }
  0xce   : > { %868 = vmatpush1.bf16.msra.mxu0 %v3363_v33  ;;  %v3908_v33 = vld [vmem:[#allocation8 + $0x104] ss:$16 sps:$4 sm:$0xff]  }
  0xcf   : > { %869 = vmatprep.subr.bf16.mxu0 %v3372_v35  ;;  %909 = vmatpush1.bf16.msra.mxu1 %v3365_v45  ;;  %v3905_v35 = vld [vmem:[#allocation8 + $0xec] ss:$16 sps:$4 sm:$0xff]   ;;  %v3915_v45 = vld [vmem:[#allocation8 + $0x128] ss:$16 sps:$4 sm:$0xff]  }
  0xd0   : > { %910 = vmatprep.subr.bf16.mxu1 %v3374_v46  ;;  %v3923_v46 = vld [vmem:[#allocation8 + $0x14c] ss:$16 sps:$4 sm:$0xff]  }
  0xd2   : > { %870 = vmatpush1.bf16.msra.mxu0 %v3371_v41  ;;  %v3920_v41 = vld [vmem:[#allocation8 + $0x144] ss:$16 sps:$4 sm:$0xff]  }
  0xd3   : > { %871 = vmatprep.subr.bf16.mxu0 %v3380_v0  ;;  %911 = vmatpush1.bf16.msra.mxu1 %v3373_v53  ;;  %v3917_v0 = vld [vmem:[#allocation8 + $0x12c] ss:$16 sps:$4 sm:$0xff]   ;;  %v3927_v53 = vld [vmem:[#allocation8 + $0x168] ss:$16 sps:$4 sm:$0xff]  }
  0xd4   : > { %912 = vmatprep.subr.bf16.mxu1 %v3382_v54  ;;  %v3935_v54 = vld [vmem:[#allocation8 + $0x18c] ss:$16 sps:$4 sm:$0xff]  }
  0xd6   : > { %872 = vmatpush1.bf16.msra.mxu0 %v3379_v48  ;;  %v3932_v48 = vld [vmem:[#allocation8 + $0x184] ss:$16 sps:$4 sm:$0xff]  }
  0xd7   : > { %873 = vmatprep.subr.bf16.mxu0 %v3388_v50  ;;  %913 = vmatpush1.bf16.msra.mxu1 %v3381_v59  ;;  %v3929_v50 = vld [vmem:[#allocation8 + $0x16c] ss:$16 sps:$4 sm:$0xff]   ;;  %v3939_v59 = vld [vmem:[#allocation8 + $0x1a8] ss:$16 sps:$4 sm:$0xff]  }
  0xd8   : > { %914 = vmatprep.subr.bf16.mxu1 %v3390_v62  ;;  %v3950_v62 = vld [vmem:[#allocation8 + $0x1e4] ss:$16 sps:$4 sm:$0xff]  }
  0xda   : > { %874 = vmatpush1.bf16.msra.mxu0 %v3387_v56  ;;  %v3936_v56 = vld [vmem:[#allocation8 + $0x1a0] ss:$16 sps:$4 sm:$0xff]  }
  0xdb   : > { %875 = vmatprep.subr.bf16.mxu0 %v3396_v58  ;;  %915 = vmatpush1.bf16.msra.mxu1 %v3389_v2  ;;  %v3944_v58 = vld [vmem:[#allocation8 + $0x1c4] ss:$16 sps:$4 sm:$0xff]   ;;  %v3953_v2 = vld [vmem:[#allocation8 + $0x1ec] ss:$16 sps:$4 sm:$0xff]  }
  0xdc   : > { %916 = vmatprep.subr.bf16.mxu1 %v3398_v4  ;;  %v3951_v4 = vld [vmem:[#allocation8 + $0x1e8] ss:$16 sps:$4 sm:$0xff]  }
  0xde   : > { %876 = vmatpush1.bf16.msra.mxu0 %v3395_v1  ;;  %v3948_v1 = vld [vmem:[#allocation8 + $0x1e0] ss:$16 sps:$4 sm:$0xff]  }
  0xdf   : > { %2517 = vmatprep.subr.bf16.mxu0 %v3860_v63  ;;  %917 = vmatpush1.bf16.msra.mxu1 %v3397_v8  ;;  %v3945_v63 = vld [vmem:[#allocation8 + $0x1c8] ss:$16 sps:$4 sm:$0xff]  }
  0xe0   : > { %2681 = vmatprep.subr.bf16.mxu1 %v3863_v7  ;;  %v419_v7 = vlaneseq }
  0xe1   : > { %894 = vmatmul.mubr.bf16.vlgmr.msra.gmra.mrb[4].mxu0 %v4779_v6 }
  0xe2   : > { %2518 = vmatpush1.bf16.msra.mxu0 %v3858_v3  ;;  %935 = vmatmul.mubr.bf16.vlgmr.msra.gmra.mrb[4].mxu1 %v4779_v6  ;;  %v3888_v6 = vld [vmem:[#allocation8 + $0xa0] ss:$16 sps:$4 sm:$0xff]   ;;  %v3956_v3 = vld [vmem:[#allocation8 + $0x204] ss:$16 sps:$4 sm:$0xff]   ;;  %v4787_v8 = vshrl.u32 %v419_v7, 7 }
  0xe3   : > { %2519 = vmatprep.subr.bf16.mxu0 %v3866_v5  ;;  %2682 = vmatpush1.bf16.msra.mxu1 %v3861_v11  ;;  %v3959_v5 = vld [vmem:[#allocation8 + $0x20c] ss:$16 sps:$4 sm:$0xff]  }
  0xe4   : > { %2683 = vmatprep.subr.bf16.mxu1 %v3869_v12  ;;  %v425_v11 = vsub.s32 1, %v4787_v8 }
  0xe6   : > { %2520 = vmatpush1.bf16.msra.mxu0 %v3864_v9  ;;  %v421_v9 = vsub.s32 0, %v4787_v8 }
  0xe7   : > { %2521 = vmatprep.subr.bf16.mxu0 %v3872_v10  ;;  %2684 = vmatpush1.bf16.msra.mxu1 %v3867_v15  ;;  %v4790_v10 = vld [vmem:[#allocation7] sm:$0xff]  ;;  %v433_v15 = vsub.s32 3, %v4787_v8 }
  0xe8   : > { %2685 = vmatprep.subr.bf16.mxu1 %v3875_v16  ;;  %v422_v12 = vrot.slane %v4790_v10, %v421_v9 }
  0xea   : > { %2522 = vmatpush1.bf16.msra.mxu0 %v3870_v13  ;;  %v426_v13 = vrot.slane %v4790_v10, %v425_v11 }
  0xeb   : > { %2523 = vmatprep.subr.bf16.mxu0 %v3878_v14  ;;  %2686 = vmatpush1.bf16.msra.mxu1 %v3873_v19 }
  0xec   : > { %2687 = vmatprep.subr.bf16.mxu1 %v3881_v20 }
  0xee   : > { %2524 = vmatpush1.bf16.msra.mxu0 %v3876_v17 }
  0xef   : > { %2525 = vmatprep.subr.bf16.mxu0 %v3884_v18  ;;  %2688 = vmatpush1.bf16.msra.mxu1 %v3879_v23  ;;  %v434_v23 = vrot.slane %v4790_v10, %v433_v15 }
  0xf0   : > { %2689 = vmatprep.subr.bf16.mxu1 %v3887_v24 }
  0xf2   : > { %2526 = vmatpush1.bf16.msra.mxu0 %v3882_v21 }
  0xf3   : > { %2527 = vmatprep.subr.bf16.mxu0 %v3890_v22  ;;  %2690 = vmatpush1.bf16.msra.mxu1 %v3885_v26 }
  0xf4   : > { %2691 = vmatprep.subr.bf16.mxu1 %v3893_v27 }
  0xf6   : > { %2528 = vmatpush1.bf16.msra.mxu0 %v3888_v6  ;;  %v3954_v6 = vld [vmem:[#allocation8 + $0x200] ss:$16 sps:$4 sm:$0xff]  }
  0xf7   : > { %2529 = vmatprep.subr.bf16.mxu0 %v3896_v25  ;;  %2692 = vmatpush1.bf16.msra.mxu1 %v3891_v30  ;;  %v3957_v25 = vld [vmem:[#allocation8 + $0x208] ss:$16 sps:$4 sm:$0xff]  }
  0xf8   : > { %2693 = vmatprep.subr.bf16.mxu1 %v3899_v31 }
  0xfa   : > { %2530 = vmatpush1.bf16.msra.mxu0 %v3894_v28  ;;  %v3962_v28 = vld [vmem:[#allocation8 + $0x224] ss:$16 sps:$4 sm:$0xff]  }
  0xfb   : > { %2531 = vmatprep.subr.bf16.mxu0 %v3902_v29  ;;  %2694 = vmatpush1.bf16.msra.mxu1 %v3897_v34  ;;  %v3965_v29 = vld [vmem:[#allocation8 + $0x22c] ss:$16 sps:$4 sm:$0xff]   ;;  %v3960_v34 = vld [vmem:[#allocation8 + $0x220] ss:$16 sps:$4 sm:$0xff]  }
  0xfc   : > { %2695 = vmatprep.subr.bf16.mxu1 %v3905_v35  ;;  %v3963_v35 = vld [vmem:[#allocation8 + $0x228] ss:$16 sps:$4 sm:$0xff]  }
  0xfe   : > { %2532 = vmatpush1.bf16.msra.mxu0 %v3900_v32 }
  0xff   : > { %2533 = vmatprep.subr.bf16.mxu0 %v3908_v33  ;;  %2696 = vmatpush1.bf16.msra.mxu1 %v3903_v38  ;;  %v3971_v38 = vld [vmem:[#allocation8 + $0x24c] ss:$16 sps:$4 sm:$0xff]  }
 0x100   : > { %2697 = vmatprep.subr.bf16.mxu1 %v3911_v39 }
 0x102   : > { %2534 = vmatpush1.bf16.msra.mxu0 %v3906_v36 }
 0x103   : > { %2535 = vmatprep.subr.bf16.mxu0 %v3914_v37  ;;  %2698 = vmatpush1.bf16.msra.mxu1 %v3909_v42  ;;  %v3968_v37 = vld [vmem:[#allocation8 + $0x244] ss:$16 sps:$4 sm:$0xff]  }
 0x104   : > { %2699 = vmatprep.subr.bf16.mxu1 %v3917_v0  ;;  %v3974_v42 = vld [vmem:[#allocation8 + $0x264] ss:$16 sps:$4 sm:$0xff]   ;;  %v3977_v0 = vld [vmem:[#allocation8 + $0x26c] ss:$16 sps:$4 sm:$0xff]  }
 0x106   : > { %2536 = vmatpush1.bf16.msra.mxu0 %v3912_v40  ;;  %v3966_v40 = vld [vmem:[#allocation8 + $0x240] ss:$16 sps:$4 sm:$0xff]  }
 0x107   : > { %2537 = vmatprep.subr.bf16.mxu0 %v3920_v41  ;;  %2700 = vmatpush1.bf16.msra.mxu1 %v3915_v45  ;;  %v3969_v41 = vld [vmem:[#allocation8 + $0x248] ss:$16 sps:$4 sm:$0xff]   ;;  %v3980_v45 = vld [vmem:[#allocation8 + $0x284] ss:$16 sps:$4 sm:$0xff]  }
 0x108   : > { %2701 = vmatprep.subr.bf16.mxu1 %v3923_v46  ;;  %v3983_v46 = vld [vmem:[#allocation8 + $0x28c] ss:$16 sps:$4 sm:$0xff]  }
 0x10a   : > { %2538 = vmatpush1.bf16.msra.mxu0 %v3918_v43  ;;  %v3972_v43 = vld [vmem:[#allocation8 + $0x260] ss:$16 sps:$4 sm:$0xff]  }
 0x10b   : > { %2539 = vmatprep.subr.bf16.mxu0 %v3926_v44  ;;  %2702 = vmatpush1.bf16.msra.mxu1 %v3921_v49  ;;  %v3975_v44 = vld [vmem:[#allocation8 + $0x268] ss:$16 sps:$4 sm:$0xff]   ;;  %v3986_v49 = vld [vmem:[#allocation8 + $0x2a4] ss:$16 sps:$4 sm:$0xff]  }
 0x10c   : > { %2703 = vmatprep.subr.bf16.mxu1 %v3929_v50  ;;  %v3989_v50 = vld [vmem:[#allocation8 + $0x2ac] ss:$16 sps:$4 sm:$0xff]  }
 0x10e   : > { %2540 = vmatpush1.bf16.msra.mxu0 %v3924_v47  ;;  %v3978_v47 = vld [vmem:[#allocation8 + $0x280] ss:$16 sps:$4 sm:$0xff]  }
 0x10f   : > { %2541 = vmatprep.subr.bf16.mxu0 %v3932_v48  ;;  %2704 = vmatpush1.bf16.msra.mxu1 %v3927_v53  ;;  %v3981_v48 = vld [vmem:[#allocation8 + $0x288] ss:$16 sps:$4 sm:$0xff]   ;;  %v3992_v53 = vld [vmem:[#allocation8 + $0x2c4] ss:$16 sps:$4 sm:$0xff]  }
 0x110   : > { %2705 = vmatprep.subr.bf16.mxu1 %v3935_v54  ;;  %v3995_v54 = vld [vmem:[#allocation8 + $0x2cc] ss:$16 sps:$4 sm:$0xff]  }
 0x112   : > { %2542 = vmatpush1.bf16.msra.mxu0 %v3930_v51  ;;  %v3984_v51 = vld [vmem:[#allocation8 + $0x2a0] ss:$16 sps:$4 sm:$0xff]  }
 0x113   : > { %2543 = vmatprep.subr.bf16.mxu0 %v3938_v52  ;;  %2706 = vmatpush1.bf16.msra.mxu1 %v3933_v55  ;;  %v3987_v52 = vld [vmem:[#allocation8 + $0x2a8] ss:$16 sps:$4 sm:$0xff]   ;;  %v3990_v55 = vld [vmem:[#allocation8 + $0x2c0] ss:$16 sps:$4 sm:$0xff]  }
 0x114   : > { %2707 = vmatprep.subr.bf16.mxu1 %v3941_v57  ;;  %v3998_v57 = vld [vmem:[#allocation8 + $0x2e4] ss:$16 sps:$4 sm:$0xff]  }
 0x116   : > { %2544 = vmatpush1.bf16.msra.mxu0 %v3936_v56  ;;  %v3993_v56 = vld [vmem:[#allocation8 + $0x2c8] ss:$16 sps:$4 sm:$0xff]  }
 0x117   : > { %2545 = vmatprep.subr.bf16.mxu0 %v3944_v58  ;;  %2708 = vmatpush1.bf16.msra.mxu1 %v3939_v59  ;;  %v4001_v58 = vld [vmem:[#allocation8 + $0x2ec] ss:$16 sps:$4 sm:$0xff]  }
 0x118   : > { %2709 = vmatprep.subr.bf16.mxu1 %v3947_v61  ;;  %v3996_v61 = vld [vmem:[#allocation8 + $0x2e0] ss:$16 sps:$4 sm:$0xff]  }
 0x11a   : > { %2546 = vmatpush1.bf16.msra.mxu0 %v3942_v60 }
 0x11b   : > { %2547 = vmatprep.subr.bf16.mxu0 %v3950_v62  ;;  %2710 = vmatpush1.bf16.msra.mxu1 %v3945_v63  ;;  %v3999_v62 = vld [vmem:[#allocation8 + $0x2e8] ss:$16 sps:$4 sm:$0xff]  }
 0x11c   : > { %2711 = vmatprep.subr.bf16.mxu1 %v3953_v2  ;;  %v4007_v2 = vld [vmem:[#allocation8 + $0x30c] ss:$16 sps:$4 sm:$0xff]  }
 0x11e   : > { %2548 = vmatpush1.bf16.msra.mxu0 %v3948_v1  ;;  %v4004_v1 = vld [vmem:[#allocation8 + $0x304] ss:$16 sps:$4 sm:$0xff]  }
 0x11f   : > { %2558 = vmatprep.subr.bf16.mxu0 %v3956_v3  ;;  %2712 = vmatpush1.bf16.msra.mxu1 %v3951_v4  ;;  %v4002_v4 = vld [vmem:[#allocation8 + $0x300] ss:$16 sps:$4 sm:$0xff]  }
 0x120   : > { %2722 = vmatprep.subr.bf16.mxu1 %v3959_v5  ;;  %v4005_v5 = vld [vmem:[#allocation8 + $0x308] ss:$16 sps:$4 sm:$0xff]  }
 0x194   : > { %v813_v14 = vpop.f32.mrb[0].mxu0  ;;  %v4803_v26 = vpop.f32.mrb[0].mxu1 }
 0x195   : > { %v814_v16 = vadd.f32 %v813_v14, %v422_v12  ;;  %v815_v17 = vpop.f32.mrb[1].mxu0  ;;  %v856_v30 = vpop.f32.mrb[1].mxu1  ;;  %v4010_v12 = vld [vmem:[#allocation8 + $0x324] ss:$16 sps:$4 sm:$0xff]  }
 0x196   : > { %v816_v18 = vadd.f32 %v815_v17, %v426_v13  ;;  %v817_v19 = vpop.f32.mrb[2].mxu0  ;;  %v857_v31 = vadd.f32 %v856_v30, %v434_v23  ;;  %v858_v32 = vpop.f32.mrb[2].mxu1  ;;  %v4013_v13 = vld [vmem:[#allocation8 + $0x32c] ss:$16 sps:$4 sm:$0xff]   ;;  %v4017_v23 = vld [vmem:[#allocation8 + $0x348] ss:$16 sps:$4 sm:$0xff]  }
 0x197   : > { %v943_v20 = vmax.f32 %v814_v16, 0.0  ;;  %v818_v21 = vpop.f32.mrb[3].mxu0  ;;  %v859_v33 = vpop.f32.mrb[3].mxu1  ;;  %v4011_v19 = vld [vmem:[#allocation8 + $0x328] ss:$16 sps:$4 sm:$0xff]   ;;  %v429_v30 = vsub.s32 2, %v4787_v8 }
 0x198   : > { %v944_v22 = vmax.f32 %v816_v18, 0.0  ;;  %v946_v36 = vmax.f32 %v857_v31, 0.0  ;;  %v4008_v18 = vld [vmem:[#allocation8 + $0x320] ss:$16 sps:$4 sm:$0xff]   ;;  %v4019_v21 = vld [vmem:[#allocation8 + $0x34c] ss:$16 sps:$4 sm:$0xff]  }
 0x199   : > { %v951_v27 = vpack.c.bf16 %v943_v20, %v943_v20  ;;  %v4016_v20 = vld [vmem:[#allocation8 + $0x344] ss:$16 sps:$4 sm:$0xff]   ;;  %v4026_v31 = vld [vmem:[#allocation8 + $0x380] ss:$16 sps:$4 sm:$0xff]   ;;  %v4029_v32 = vld [vmem:[#allocation8 + $0x388] ss:$16 sps:$4 sm:$0xff]  }
 0x19a   : > { %v952_v24 = vpack.c.bf16 %v944_v22, %v944_v22  ;;  %v954_v39 = vpack.c.bf16 %v946_v36, %v946_v36  ;;  %v4014_v22 = vld [vmem:[#allocation8 + $0x340] ss:$16 sps:$4 sm:$0xff]   ;;  %v4034_v33 = vld [vmem:[#allocation8 + $0x3a4] ss:$16 sps:$4 sm:$0xff]   ;;  %v430_v36 = vrot.slane %v4790_v10, %v429_v30 }
 0x19c   : > { %2549 = vmatprep.mubr.bf16.mxu0 %v952_v24  ;;  %2713 = vmatprep.mubr.bf16.mxu1 %v952_v24  ;;  %v4022_v24 = vld [vmem:[#allocation8 + $0x364] ss:$16 sps:$4 sm:$0xff]  }
 0x19d   : > { %2550 = vmatmul.mubr.bf16.vlgmr.msra.gmra.mrb[8].mxu0 %v951_v27  ;;  %2714 = vmatmul.mubr.bf16.vlgmr.msra.gmra.mrb[8].mxu1 %v951_v27  ;;  %v4023_v27 = vld [vmem:[#allocation8 + $0x368] ss:$16 sps:$4 sm:$0xff]  }
 0x19e   : > { %2559 = vmatpush1.bf16.msra.mxu0 %v3954_v6  ;;  %2723 = vmatpush1.bf16.msra.mxu1 %v3957_v25  ;;  %v4025_v6 = vld [vmem:[#allocation8 + $0x36c] ss:$16 sps:$4 sm:$0xff]   ;;  %v4020_v25 = vld [vmem:[#allocation8 + $0x360] ss:$16 sps:$4 sm:$0xff]  }
 0x19f   : > { %2560 = vmatprep.subr.bf16.mxu0 %v3962_v28  ;;  %2724 = vmatprep.subr.bf16.mxu1 %v3965_v29  ;;  %v4028_v28 = vld [vmem:[#allocation8 + $0x384] ss:$16 sps:$4 sm:$0xff]   ;;  %v4031_v29 = vld [vmem:[#allocation8 + $0x38c] ss:$16 sps:$4 sm:$0xff]  }
 0x1a0   : > { %2590 = vmatprep.mubr.bf16.mxu0 %v954_v39  ;;  %2754 = vmatprep.mubr.bf16.mxu1 %v954_v39  ;;  %v4040_v39 = vld [vmem:[#allocation8 + $0x3c4] ss:$16 sps:$4 sm:$0xff]  }
 0x1a2   : > { %2561 = vmatpush1.bf16.msra.mxu0 %v3960_v34  ;;  %2725 = vmatpush1.bf16.msra.mxu1 %v3963_v35  ;;  %v4037_v34 = vld [vmem:[#allocation8 + $0x3ac] ss:$16 sps:$4 sm:$0xff]   ;;  %v441_v35 = vsub.s32 5, %v4787_v8 }
 0x1a3   : > { %2562 = vmatprep.subr.bf16.mxu0 %v3968_v37  ;;  %2726 = vmatprep.subr.bf16.mxu1 %v3971_v38  ;;  %v4032_v37 = vld [vmem:[#allocation8 + $0x3a0] ss:$16 sps:$4 sm:$0xff]   ;;  %v4035_v38 = vld [vmem:[#allocation8 + $0x3a8] ss:$16 sps:$4 sm:$0xff]  }
 0x1a6   : > { %2563 = vmatpush1.bf16.msra.mxu0 %v3966_v40  ;;  %2727 = vmatpush1.bf16.msra.mxu1 %v3969_v41  ;;  %v4043_v40 = vld [vmem:[#allocation8 + $0x3cc] ss:$16 sps:$4 sm:$0xff]   ;;  %v442_v41 = vrot.slane %v4790_v10, %v441_v35  ;;  %v4106_v35 = vld [vmem:[#allocation8 + $0x524] ss:$16 sps:$4 sm:$0xff]  }
 0x1a7   : > { %2564 = vmatprep.subr.bf16.mxu0 %v3974_v42  ;;  %2728 = vmatprep.subr.bf16.mxu1 %v3977_v0  ;;  %v855_v42 = vadd.f32 %v4803_v26, %v430_v36  ;;  %v4038_v0 = vld [vmem:[#allocation8 + $0x3c0] ss:$16 sps:$4 sm:$0xff]   ;;  %v4109_v36 = vld [vmem:[#allocation8 + $0x52c] ss:$16 sps:$4 sm:$0xff]  }
 0x1aa   : > { %2565 = vmatpush1.bf16.msra.mxu0 %v3972_v43  ;;  %2729 = vmatpush1.bf16.msra.mxu1 %v3975_v44  ;;  %v4041_v43 = vld [vmem:[#allocation8 + $0x3c8] ss:$16 sps:$4 sm:$0xff]   ;;  %v4046_v44 = vld [vmem:[#allocation8 + $0x3e4] ss:$16 sps:$4 sm:$0xff]  }
 0x1ab   : > { %2566 = vmatprep.subr.bf16.mxu0 %v3980_v45  ;;  %2730 = vmatprep.subr.bf16.mxu1 %v3983_v46  ;;  %v4049_v45 = vld [vmem:[#allocation8 + $0x3ec] ss:$16 sps:$4 sm:$0xff]  }
 0x1ae   : > { %2567 = vmatpush1.bf16.msra.mxu0 %v3978_v47  ;;  %2731 = vmatpush1.bf16.msra.mxu1 %v3981_v48  ;;  %v945_v47 = vmax.f32 %v855_v42, 0.0  ;;  %v4044_v48 = vld [vmem:[#allocation8 + $0x3e0] ss:$16 sps:$4 sm:$0xff]   ;;  %v4113_v42 = vld [vmem:[#allocation8 + $0x548] ss:$16 sps:$4 sm:$0xff]  }
 0x1af   : > { %2568 = vmatprep.subr.bf16.mxu0 %v3986_v49  ;;  %2732 = vmatprep.subr.bf16.mxu1 %v3989_v50  ;;  %v4047_v49 = vld [vmem:[#allocation8 + $0x3e8] ss:$16 sps:$4 sm:$0xff]   ;;  %v4052_v50 = vld [vmem:[#allocation8 + $0x404] ss:$16 sps:$4 sm:$0xff]  }
 0x1b2   : > { %2569 = vmatpush1.bf16.msra.mxu0 %v3984_v51  ;;  %2733 = vmatpush1.bf16.msra.mxu1 %v3987_v52  ;;  %v4055_v51 = vld [vmem:[#allocation8 + $0x40c] ss:$16 sps:$4 sm:$0xff]   ;;  %v953_v52 = vpack.c.bf16 %v945_v47, %v945_v47 }
 0x1b3   : > { %2570 = vmatprep.subr.bf16.mxu0 %v3992_v53  ;;  %2734 = vmatprep.subr.bf16.mxu1 %v3995_v54  ;;  %v4050_v53 = vld [vmem:[#allocation8 + $0x400] ss:$16 sps:$4 sm:$0xff]   ;;  %v4053_v54 = vld [vmem:[#allocation8 + $0x408] ss:$16 sps:$4 sm:$0xff]   ;;  %v4127_v47 = vld [vmem:[#allocation8 + $0x58c] ss:$16 sps:$4 sm:$0xff]  }
 0x1b4   : > { %v4805_v59 = vpop.f32.mrb[4].mxu0 }
 0x1b5   : > { %v4807_v60 = vpop.f32.mrb[5].mxu0  ;;  %v4809_v7 = vpop.f32.mrb[4].mxu1 }
 0x1b6   : > { %2571 = vmatpush1.bf16.msra.mxu0 %v3990_v55  ;;  %2735 = vmatpush1.bf16.msra.mxu1 %v3993_v56  ;;  %v899_v63 = vpop.f32.mrb[6].mxu0  ;;  %v4811_v14 = vpop.f32.mrb[5].mxu1  ;;  %v898_v46 = vadd.f32 %v4807_v60, %v442_v41  ;;  %v4058_v55 = vld [vmem:[#allocation8 + $0x424] ss:$16 sps:$4 sm:$0xff]   ;;  %v4061_v56 = vld [vmem:[#allocation8 + $0x42c] ss:$16 sps:$4 sm:$0xff]  }
 0x1b7   : > { %2572 = vmatprep.subr.bf16.mxu0 %v3998_v57  ;;  %2736 = vmatprep.subr.bf16.mxu1 %v4001_v58  ;;  %v900_v3 = vpop.f32.mrb[7].mxu0  ;;  %v940_v16 = vpop.f32.mrb[6].mxu1  ;;  %v4056_v58 = vld [vmem:[#allocation8 + $0x420] ss:$16 sps:$4 sm:$0xff]   ;;  %v4059_v60 = vld [vmem:[#allocation8 + $0x428] ss:$16 sps:$4 sm:$0xff]  }
 0x1b8   : > { %v941_v17 = vpop.f32.mrb[7].mxu1  ;;  %v948_v26 = vmax.f32 %v898_v46, 0.0  ;;  %v4062_v63 = vld [vmem:[#allocation8 + $0x440] ss:$16 sps:$4 sm:$0xff]   ;;  %v4073_v3 = vld [vmem:[#allocation8 + $0x46c] ss:$16 sps:$4 sm:$0xff]  }
 0x1b9   : > { %v4074_v16 = vld [vmem:[#allocation8 + $0x480] ss:$16 sps:$4 sm:$0xff]   ;;  %v4077_v17 = vld [vmem:[#allocation8 + $0x488] ss:$16 sps:$4 sm:$0xff]   ;;  %v4124_v46 = vld [vmem:[#allocation8 + $0x584] ss:$16 sps:$4 sm:$0xff]  }
 0x1ba   : > { %2573 = vmatpush1.bf16.msra.mxu0 %v3996_v61  ;;  %2737 = vmatpush1.bf16.msra.mxu1 %v3999_v62  ;;  %v956_v57 = vpack.c.bf16 %v948_v26, %v948_v26  ;;  %v4064_v61 = vld [vmem:[#allocation8 + $0x444] ss:$16 sps:$4 sm:$0xff]   ;;  %v4067_v62 = vld [vmem:[#allocation8 + $0x44c] ss:$16 sps:$4 sm:$0xff]   ;;  %v4110_v41 = vld [vmem:[#allocation8 + $0x540] ss:$16 sps:$4 sm:$0xff]  }
 0x1bb   : > { %2574 = vmatprep.subr.bf16.mxu0 %v4004_v1  ;;  %2738 = vmatprep.subr.bf16.mxu1 %v4007_v2  ;;  %v4065_v1 = vld [vmem:[#allocation8 + $0x448] ss:$16 sps:$4 sm:$0xff]   ;;  %v4070_v2 = vld [vmem:[#allocation8 + $0x464] ss:$16 sps:$4 sm:$0xff]   ;;  %v4133_v26 = vld [vmem:[#allocation8 + $0x5ac] ss:$16 sps:$4 sm:$0xff]  }
 0x1be   : > { %2575 = vmatpush1.bf16.msra.mxu0 %v4002_v4  ;;  %2739 = vmatpush1.bf16.msra.mxu1 %v4005_v5  ;;  %v4068_v4 = vld [vmem:[#allocation8 + $0x460] ss:$16 sps:$4 sm:$0xff]   ;;  %v4071_v5 = vld [vmem:[#allocation8 + $0x468] ss:$16 sps:$4 sm:$0xff]  }
 0x1bf   : > { %2576 = vmatprep.subr.bf16.mxu0 %v4010_v12  ;;  %2740 = vmatprep.subr.bf16.mxu1 %v4013_v13  ;;  %v4076_v12 = vld [vmem:[#allocation8 + $0x484] ss:$16 sps:$4 sm:$0xff]   ;;  %v4079_v13 = vld [vmem:[#allocation8 + $0x48c] ss:$16 sps:$4 sm:$0xff]  }
 0x1c2   : > { %2577 = vmatpush1.bf16.msra.mxu0 %v4008_v18  ;;  %2741 = vmatpush1.bf16.msra.mxu1 %v4011_v19  ;;  %v4082_v18 = vld [vmem:[#allocation8 + $0x4a4] ss:$16 sps:$4 sm:$0xff]   ;;  %v4085_v19 = vld [vmem:[#allocation8 + $0x4ac] ss:$16 sps:$4 sm:$0xff]  }
 0x1c3   : > { %2578 = vmatprep.subr.bf16.mxu0 %v4016_v20  ;;  %2742 = vmatprep.subr.bf16.mxu1 %v4019_v21  ;;  %v4080_v20 = vld [vmem:[#allocation8 + $0x4a0] ss:$16 sps:$4 sm:$0xff]   ;;  %v4083_v21 = vld [vmem:[#allocation8 + $0x4a8] ss:$16 sps:$4 sm:$0xff]  }
 0x1c6   : > { %2579 = vmatpush1.bf16.msra.mxu0 %v4014_v22  ;;  %2743 = vmatpush1.bf16.msra.mxu1 %v4017_v23  ;;  %v4088_v22 = vld [vmem:[#allocation8 + $0x4c4] ss:$16 sps:$4 sm:$0xff]   ;;  %v4091_v23 = vld [vmem:[#allocation8 + $0x4cc] ss:$16 sps:$4 sm:$0xff]  }
 0x1c7   : > { %2580 = vmatprep.subr.bf16.mxu0 %v4022_v24  ;;  %2744 = vmatprep.subr.bf16.mxu1 %v4025_v6  ;;  %v4086_v24 = vld [vmem:[#allocation8 + $0x4c0] ss:$16 sps:$4 sm:$0xff]   ;;  %v4089_v6 = vld [vmem:[#allocation8 + $0x4c8] ss:$16 sps:$4 sm:$0xff]  }
 0x1ca   : > { %2581 = vmatpush1.bf16.msra.mxu0 %v4020_v25  ;;  %2745 = vmatpush1.bf16.msra.mxu1 %v4023_v27  ;;  %v4094_v25 = vld [vmem:[#allocation8 + $0x4e4] ss:$16 sps:$4 sm:$0xff]   ;;  %v4097_v27 = vld [vmem:[#allocation8 + $0x4ec] ss:$16 sps:$4 sm:$0xff]  }
 0x1cb   : > { %2582 = vmatprep.subr.bf16.mxu0 %v4028_v28  ;;  %2746 = vmatprep.subr.bf16.mxu1 %v4031_v29  ;;  %v4092_v28 = vld [vmem:[#allocation8 + $0x4e0] ss:$16 sps:$4 sm:$0xff]   ;;  %v4095_v29 = vld [vmem:[#allocation8 + $0x4e8] ss:$16 sps:$4 sm:$0xff]  }
 0x1ce   : > { %2583 = vmatpush1.bf16.msra.mxu0 %v4026_v31  ;;  %2747 = vmatpush1.bf16.msra.mxu1 %v4029_v32  ;;  %v4100_v31 = vld [vmem:[#allocation8 + $0x504] ss:$16 sps:$4 sm:$0xff]   ;;  %v4103_v32 = vld [vmem:[#allocation8 + $0x50c] ss:$16 sps:$4 sm:$0xff]  }
 0x1cf   : > { %2584 = vmatprep.subr.bf16.mxu0 %v4034_v33  ;;  %2748 = vmatprep.subr.bf16.mxu1 %v4037_v34  ;;  %v4098_v33 = vld [vmem:[#allocation8 + $0x500] ss:$16 sps:$4 sm:$0xff]   ;;  %v4101_v34 = vld [vmem:[#allocation8 + $0x508] ss:$16 sps:$4 sm:$0xff]  }
 0x1d2   : > { %2585 = vmatpush1.bf16.msra.mxu0 %v4032_v37  ;;  %2749 = vmatpush1.bf16.msra.mxu1 %v4035_v38  ;;  %v4104_v37 = vld [vmem:[#allocation8 + $0x520] ss:$16 sps:$4 sm:$0xff]   ;;  %v4107_v38 = vld [vmem:[#allocation8 + $0x528] ss:$16 sps:$4 sm:$0xff]  }
 0x1d3   : > { %2586 = vmatprep.subr.bf16.mxu0 %v4040_v39  ;;  %2750 = vmatprep.subr.bf16.mxu1 %v4043_v40  ;;  %v4112_v39 = vld [vmem:[#allocation8 + $0x544] ss:$16 sps:$4 sm:$0xff]   ;;  %v4115_v40 = vld [vmem:[#allocation8 + $0x54c] ss:$16 sps:$4 sm:$0xff]  }
 0x1d6   : > { %2587 = vmatpush1.bf16.msra.mxu0 %v4038_v0  ;;  %2751 = vmatpush1.bf16.msra.mxu1 %v4041_v43  ;;  %v4118_v0 = vld [vmem:[#allocation8 + $0x564] ss:$16 sps:$4 sm:$0xff]   ;;  %v4121_v43 = vld [vmem:[#allocation8 + $0x56c] ss:$16 sps:$4 sm:$0xff]  }
 0x1d7   : > { %2588 = vmatprep.subr.bf16.mxu0 %v4046_v44  ;;  %2752 = vmatprep.subr.bf16.mxu1 %v4049_v45  ;;  %v4116_v44 = vld [vmem:[#allocation8 + $0x560] ss:$16 sps:$4 sm:$0xff]   ;;  %v4119_v45 = vld [vmem:[#allocation8 + $0x568] ss:$16 sps:$4 sm:$0xff]  }
 0x1da   : > { %2589 = vmatpush1.bf16.msra.mxu0 %v4044_v48  ;;  %2753 = vmatpush1.bf16.msra.mxu1 %v4047_v49  ;;  %v437_v48 = vsub.s32 4, %v4787_v8  ;;  %v4122_v49 = vld [vmem:[#allocation8 + $0x580] ss:$16 sps:$4 sm:$0xff]  }
 0x1db   : > { %2599 = vmatprep.subr.bf16.mxu0 %v4052_v50  ;;  %2763 = vmatprep.subr.bf16.mxu1 %v4055_v51  ;;  %v4125_v50 = vld [vmem:[#allocation8 + $0x588] ss:$16 sps:$4 sm:$0xff]   ;;  %v4130_v51 = vld [vmem:[#allocation8 + $0x5a4] ss:$16 sps:$4 sm:$0xff]  }
 0x1dd   : > { %2591 = vmatmul.mubr.bf16.vlgmr.msra.gmra.mrb[8].mxu0 %v953_v52  ;;  %2755 = vmatmul.mubr.bf16.vlgmr.msra.gmra.mrb[8].mxu1 %v953_v52  ;;  %v449_v52 = vsub.s32 7, %v4787_v8 }
 0x1de   : > { %2600 = vmatpush1.bf16.msra.mxu0 %v4050_v53  ;;  %2764 = vmatpush1.bf16.msra.mxu1 %v4053_v54  ;;  %v438_v53 = vrot.slane %v4790_v10, %v437_v48  ;;  %v4128_v54 = vld [vmem:[#allocation8 + $0x5a0] ss:$16 sps:$4 sm:$0xff]   ;;  %v4199_v48 = vld [vmem:[#allocation8 + $0x70c] ss:$16 sps:$4 sm:$0xff]  }
 0x1df   : > { %2601 = vmatprep.subr.bf16.mxu0 %v4058_v55  ;;  %2765 = vmatprep.subr.bf16.mxu1 %v4061_v56  ;;  %v4131_v55 = vld [vmem:[#allocation8 + $0x5a8] ss:$16 sps:$4 sm:$0xff]   ;;  %v4136_v56 = vld [vmem:[#allocation8 + $0x5c4] ss:$16 sps:$4 sm:$0xff]  }
 0x1e0   : > { %2631 = vmatprep.mubr.bf16.mxu0 %v956_v57  ;;  %2795 = vmatprep.mubr.bf16.mxu1 %v956_v57  ;;  %v4139_v57 = vld [vmem:[#allocation8 + $0x5cc] ss:$16 sps:$4 sm:$0xff]  }
 0x1e2   : > { %2602 = vmatpush1.bf16.msra.mxu0 %v4056_v58  ;;  %2766 = vmatpush1.bf16.msra.mxu1 %v4059_v60  ;;  %v450_v58 = vrot.slane %v4790_v10, %v449_v52  ;;  %v896_v60 = vadd.f32 %v4805_v59, %v438_v53  ;;  %v4200_v52 = vld [vmem:[#allocation8 + $0x720] ss:$16 sps:$4 sm:$0xff]   ;;  %v4203_v53 = vld [vmem:[#allocation8 + $0x728] ss:$16 sps:$4 sm:$0xff]  }
 0x1e3   : > { %2603 = vmatprep.subr.bf16.mxu0 %v4064_v61  ;;  %2767 = vmatprep.subr.bf16.mxu1 %v4067_v62  ;;  %v4134_v61 = vld [vmem:[#allocation8 + $0x5c0] ss:$16 sps:$4 sm:$0xff]   ;;  %v4137_v62 = vld [vmem:[#allocation8 + $0x5c8] ss:$16 sps:$4 sm:$0xff]  }
 0x1e6   : > { %2604 = vmatpush1.bf16.msra.mxu0 %v4062_v63  ;;  %2768 = vmatpush1.bf16.msra.mxu1 %v4065_v1  ;;  %v4142_v63 = vld [vmem:[#allocation8 + $0x5e4] ss:$16 sps:$4 sm:$0xff]   ;;  %v4145_v1 = vld [vmem:[#allocation8 + $0x5ec] ss:$16 sps:$4 sm:$0xff]  }
 0x1e7   : > { %2605 = vmatprep.subr.bf16.mxu0 %v4070_v2  ;;  %2769 = vmatprep.subr.bf16.mxu1 %v4073_v3  ;;  %v939_v2 = vadd.f32 %v4811_v14, %v450_v58  ;;  %v947_v3 = vmax.f32 %v896_v60, 0.0  ;;  %v4214_v58 = vld [vmem:[#allocation8 + $0x764] ss:$16 sps:$4 sm:$0xff]   ;;  %v4217_v60 = vld [vmem:[#allocation8 + $0x76c] ss:$16 sps:$4 sm:$0xff]  }
 0x1e9   : > { %v950_v59 = vmax.f32 %v939_v2, 0.0  ;;  %v4218_v2 = vld [vmem:[#allocation8 + $0x780] ss:$16 sps:$4 sm:$0xff]  }
 0x1ea   : > { %2606 = vmatpush1.bf16.msra.mxu0 %v4068_v4  ;;  %2770 = vmatpush1.bf16.msra.mxu1 %v4071_v5  ;;  %v4140_v4 = vld [vmem:[#allocation8 + $0x5e0] ss:$16 sps:$4 sm:$0xff]   ;;  %v4143_v5 = vld [vmem:[#allocation8 + $0x5e8] ss:$16 sps:$4 sm:$0xff]  }
 0x1eb   : > { %2607 = vmatprep.subr.bf16.mxu0 %v4076_v12  ;;  %2771 = vmatprep.subr.bf16.mxu1 %v4079_v13  ;;  %v4148_v12 = vld [vmem:[#allocation8 + $0x604] ss:$16 sps:$4 sm:$0xff]   ;;  %v4151_v13 = vld [vmem:[#allocation8 + $0x60c] ss:$16 sps:$4 sm:$0xff]   ;;  %v958_v14 = vpack.c.bf16 %v950_v59, %v950_v59  ;;  %v4227_v59 = vld [vmem:[#allocation8 + $0x7a8] ss:$16 sps:$4 sm:$0xff]  }
 0x1ee   : > { %2608 = vmatpush1.bf16.msra.mxu0 %v4074_v16  ;;  %2772 = vmatpush1.bf16.msra.mxu1 %v4077_v17  ;;  %v955_v16 = vpack.c.bf16 %v947_v3, %v947_v3  ;;  %v4146_v17 = vld [vmem:[#allocation8 + $0x600] ss:$16 sps:$4 sm:$0xff]   ;;  %v4221_v3 = vld [vmem:[#allocation8 + $0x788] ss:$16 sps:$4 sm:$0xff]  }
 0x1ef   : > { %2609 = vmatprep.subr.bf16.mxu0 %v4082_v18  ;;  %2773 = vmatprep.subr.bf16.mxu1 %v4085_v19  ;;  %v4149_v18 = vld [vmem:[#allocation8 + $0x608] ss:$16 sps:$4 sm:$0xff]   ;;  %v4154_v19 = vld [vmem:[#allocation8 + $0x624] ss:$16 sps:$4 sm:$0xff]  }
 0x1f2   : > { %2610 = vmatpush1.bf16.msra.mxu0 %v4080_v20  ;;  %2774 = vmatpush1.bf16.msra.mxu1 %v4083_v21  ;;  %v4157_v20 = vld [vmem:[#allocation8 + $0x62c] ss:$16 sps:$4 sm:$0xff]   ;;  %v4152_v21 = vld [vmem:[#allocation8 + $0x620] ss:$16 sps:$4 sm:$0xff]  }
 0x1f3   : > { %2611 = vmatprep.subr.bf16.mxu0 %v4088_v22  ;;  %2775 = vmatprep.subr.bf16.mxu1 %v4091_v23  ;;  %v4155_v22 = vld [vmem:[#allocation8 + $0x628] ss:$16 sps:$4 sm:$0xff]   ;;  %v4160_v23 = vld [vmem:[#allocation8 + $0x644] ss:$16 sps:$4 sm:$0xff]  }
 0x1f6   : > { %2612 = vmatpush1.bf16.msra.mxu0 %v4086_v24  ;;  %2776 = vmatpush1.bf16.msra.mxu1 %v4089_v6  ;;  %v4163_v24 = vld [vmem:[#allocation8 + $0x64c] ss:$16 sps:$4 sm:$0xff]   ;;  %v4158_v6 = vld [vmem:[#allocation8 + $0x640] ss:$16 sps:$4 sm:$0xff]  }
 0x1f7   : > { %2613 = vmatprep.subr.bf16.mxu0 %v4094_v25  ;;  %2777 = vmatprep.subr.bf16.mxu1 %v4097_v27  ;;  %v4161_v25 = vld [vmem:[#allocation8 + $0x648] ss:$16 sps:$4 sm:$0xff]   ;;  %v4166_v27 = vld [vmem:[#allocation8 + $0x664] ss:$16 sps:$4 sm:$0xff]  }
 0x1fa   : > { %2614 = vmatpush1.bf16.msra.mxu0 %v4092_v28  ;;  %2778 = vmatpush1.bf16.msra.mxu1 %v4095_v29  ;;  %v4169_v28 = vld [vmem:[#allocation8 + $0x66c] ss:$16 sps:$4 sm:$0xff]   ;;  %v4164_v29 = vld [vmem:[#allocation8 + $0x660] ss:$16 sps:$4 sm:$0xff]  }
 0x1fb   : > { %2615 = vmatprep.subr.bf16.mxu0 %v4100_v31  ;;  %2779 = vmatprep.subr.bf16.mxu1 %v4103_v32  ;;  %v4167_v31 = vld [vmem:[#allocation8 + $0x668] ss:$16 sps:$4 sm:$0xff]   ;;  %v4172_v32 = vld [vmem:[#allocation8 + $0x684] ss:$16 sps:$4 sm:$0xff]  }
 0x1fe   : > { %2616 = vmatpush1.bf16.msra.mxu0 %v4098_v33  ;;  %2780 = vmatpush1.bf16.msra.mxu1 %v4101_v34  ;;  %v4175_v33 = vld [vmem:[#allocation8 + $0x68c] ss:$16 sps:$4 sm:$0xff]   ;;  %v4170_v34 = vld [vmem:[#allocation8 + $0x680] ss:$16 sps:$4 sm:$0xff]  }
 0x1ff   : > { %2617 = vmatprep.subr.bf16.mxu0 %v4106_v35  ;;  %2781 = vmatprep.subr.bf16.mxu1 %v4109_v36  ;;  %v4173_v35 = vld [vmem:[#allocation8 + $0x688] ss:$16 sps:$4 sm:$0xff]   ;;  %v4178_v36 = vld [vmem:[#allocation8 + $0x6a4] ss:$16 sps:$4 sm:$0xff]  }
 0x202   : > { %2618 = vmatpush1.bf16.msra.mxu0 %v4104_v37  ;;  %2782 = vmatpush1.bf16.msra.mxu1 %v4107_v38  ;;  %v4181_v37 = vld [vmem:[#allocation8 + $0x6ac] ss:$16 sps:$4 sm:$0xff]   ;;  %v4176_v38 = vld [vmem:[#allocation8 + $0x6a0] ss:$16 sps:$4 sm:$0xff]  }
 0x203   : > { %2619 = vmatprep.subr.bf16.mxu0 %v4112_v39  ;;  %2783 = vmatprep.subr.bf16.mxu1 %v4115_v40  ;;  %v4179_v39 = vld [vmem:[#allocation8 + $0x6a8] ss:$16 sps:$4 sm:$0xff]   ;;  %v4184_v40 = vld [vmem:[#allocation8 + $0x6c4] ss:$16 sps:$4 sm:$0xff]  }
 0x206   : > { %2620 = vmatpush1.bf16.msra.mxu0 %v4110_v41  ;;  %2784 = vmatpush1.bf16.msra.mxu1 %v4113_v42  ;;  %v4187_v41 = vld [vmem:[#allocation8 + $0x6cc] ss:$16 sps:$4 sm:$0xff]   ;;  %v4182_v42 = vld [vmem:[#allocation8 + $0x6c0] ss:$16 sps:$4 sm:$0xff]  }
 0x207   : > { %2621 = vmatprep.subr.bf16.mxu0 %v4118_v0  ;;  %2785 = vmatprep.subr.bf16.mxu1 %v4121_v43  ;;  %v4185_v0 = vld [vmem:[#allocation8 + $0x6c8] ss:$16 sps:$4 sm:$0xff]   ;;  %v4190_v43 = vld [vmem:[#allocation8 + $0x6e4] ss:$16 sps:$4 sm:$0xff]  }
 0x20a   : > { %2622 = vmatpush1.bf16.msra.mxu0 %v4116_v44  ;;  %2786 = vmatpush1.bf16.msra.mxu1 %v4119_v45  ;;  %v4193_v44 = vld [vmem:[#allocation8 + $0x6ec] ss:$16 sps:$4 sm:$0xff]   ;;  %v4188_v45 = vld [vmem:[#allocation8 + $0x6e0] ss:$16 sps:$4 sm:$0xff]  }
 0x20b   : > { %2623 = vmatprep.subr.bf16.mxu0 %v4124_v46  ;;  %2787 = vmatprep.subr.bf16.mxu1 %v4127_v47  ;;  %v4191_v46 = vld [vmem:[#allocation8 + $0x6e8] ss:$16 sps:$4 sm:$0xff]   ;;  %v4196_v47 = vld [vmem:[#allocation8 + $0x704] ss:$16 sps:$4 sm:$0xff]  }
 0x20e   : > { %2624 = vmatpush1.bf16.msra.mxu0 %v4122_v49  ;;  %2788 = vmatpush1.bf16.msra.mxu1 %v4125_v50  ;;  %v4194_v49 = vld [vmem:[#allocation8 + $0x700] ss:$16 sps:$4 sm:$0xff]   ;;  %v4197_v50 = vld [vmem:[#allocation8 + $0x708] ss:$16 sps:$4 sm:$0xff]  }
 0x20f   : > { %2625 = vmatprep.subr.bf16.mxu0 %v4130_v51  ;;  %2789 = vmatprep.subr.bf16.mxu1 %v4133_v26  ;;  %v4202_v51 = vld [vmem:[#allocation8 + $0x724] ss:$16 sps:$4 sm:$0xff]   ;;  %v4205_v26 = vld [vmem:[#allocation8 + $0x72c] ss:$16 sps:$4 sm:$0xff]  }
 0x212   : > { %2626 = vmatpush1.bf16.msra.mxu0 %v4128_v54  ;;  %2790 = vmatpush1.bf16.msra.mxu1 %v4131_v55  ;;  %v4208_v54 = vld [vmem:[#allocation8 + $0x744] ss:$16 sps:$4 sm:$0xff]   ;;  %v4211_v55 = vld [vmem:[#allocation8 + $0x74c] ss:$16 sps:$4 sm:$0xff]  }
 0x213   : > { %2627 = vmatprep.subr.bf16.mxu0 %v4136_v56  ;;  %2791 = vmatprep.subr.bf16.mxu1 %v4139_v57  ;;  %v4206_v56 = vld [vmem:[#allocation8 + $0x740] ss:$16 sps:$4 sm:$0xff]   ;;  %v4209_v57 = vld [vmem:[#allocation8 + $0x748] ss:$16 sps:$4 sm:$0xff]  }
 0x216   : > { %2628 = vmatpush1.bf16.msra.mxu0 %v4134_v61  ;;  %2792 = vmatpush1.bf16.msra.mxu1 %v4137_v62  ;;  %v4212_v61 = vld [vmem:[#allocation8 + $0x760] ss:$16 sps:$4 sm:$0xff]   ;;  %v4215_v62 = vld [vmem:[#allocation8 + $0x768] ss:$16 sps:$4 sm:$0xff]  }
 0x217   : > { %2629 = vmatprep.subr.bf16.mxu0 %v4142_v63  ;;  %2793 = vmatprep.subr.bf16.mxu1 %v4145_v1  ;;  %v4220_v63 = vld [vmem:[#allocation8 + $0x784] ss:$16 sps:$4 sm:$0xff]   ;;  %v4223_v1 = vld [vmem:[#allocation8 + $0x78c] ss:$16 sps:$4 sm:$0xff]  }
 0x21a   : > { %2630 = vmatpush1.bf16.msra.mxu0 %v4140_v4  ;;  %2794 = vmatpush1.bf16.msra.mxu1 %v4143_v5  ;;  %v445_v4 = vsub.s32 6, %v4787_v8  ;;  %v4226_v5 = vld [vmem:[#allocation8 + $0x7a4] ss:$16 sps:$4 sm:$0xff]  }
 0x21b   : > { %2640 = vmatprep.subr.bf16.mxu0 %v4148_v12  ;;  %2804 = vmatprep.subr.bf16.mxu1 %v4151_v13  ;;  %v4229_v12 = vld [vmem:[#allocation8 + $0x7ac] ss:$16 sps:$4 sm:$0xff]   ;;  %v4224_v13 = vld [vmem:[#allocation8 + $0x7a0] ss:$16 sps:$4 sm:$0xff]  }
 0x21d   : > { %2632 = vmatmul.mubr.bf16.vlgmr.msra.gmra.mrb[8].mxu0 %v955_v16  ;;  %2796 = vmatmul.mubr.bf16.vlgmr.msra.gmra.mrb[8].mxu1 %v955_v16  ;;  %v446_v16 = vrot.slane %v4790_v10, %v445_v4  ;;  %v4242_v10 = vld [vmem:[#allocation10 + $0x40] sm:$0xff]  }
 0x21e   : > { %2641 = vmatpush1.bf16.msra.mxu0 %v4146_v17  ;;  %2805 = vmatpush1.bf16.msra.mxu1 %v4149_v18  ;;  %v4232_v17 = vld [vmem:[#allocation8 + $0x7c4] ss:$16 sps:$4 sm:$0xff]   ;;  %v4235_v18 = vld [vmem:[#allocation8 + $0x7cc] ss:$16 sps:$4 sm:$0xff]  }
 0x21f   : > { %2642 = vmatprep.subr.bf16.mxu0 %v4154_v19  ;;  %2806 = vmatprep.subr.bf16.mxu1 %v4157_v20  ;;  %v4230_v19 = vld [vmem:[#allocation8 + $0x7c0] ss:$16 sps:$4 sm:$0xff]   ;;  %v4233_v20 = vld [vmem:[#allocation8 + $0x7c8] ss:$16 sps:$4 sm:$0xff]  }
 0x220   : > { %2672 = vmatprep.mubr.bf16.mxu0 %v958_v14  ;;  %2836 = vmatprep.mubr.bf16.mxu1 %v958_v14  ;;  %v937_v14 = vadd.f32 %v4809_v7, %v446_v16  ;;  %v4246_v7 = vld [vmem:[#allocation10 + $0x48] sm:$0xff]  }
 0x222   : > { %2643 = vmatpush1.bf16.msra.mxu0 %v4152_v21  ;;  %2807 = vmatpush1.bf16.msra.mxu1 %v4155_v22  ;;  %v4238_v21 = vld [vmem:[#allocation8 + $0x7e4] ss:$16 sps:$4 sm:$0xff]   ;;  %v4241_v22 = vld [vmem:[#allocation8 + $0x7ec] ss:$16 sps:$4 sm:$0xff]  }
 0x223   : > { %2644 = vmatprep.subr.bf16.mxu0 %v4160_v23  ;;  %2808 = vmatprep.subr.bf16.mxu1 %v4163_v24  ;;  %v4236_v23 = vld [vmem:[#allocation8 + $0x7e0] ss:$16 sps:$4 sm:$0xff]   ;;  %v4239_v24 = vld [vmem:[#allocation8 + $0x7e8] ss:$16 sps:$4 sm:$0xff]  }
 0x226   : > { %2645 = vmatpush1.bf16.msra.mxu0 %v4158_v6  ;;  %2809 = vmatpush1.bf16.msra.mxu1 %v4161_v25  ;;  %v949_v6 = vmax.f32 %v937_v14, 0.0  ;;  %v4243_v25 = vld [vmem:[#allocation10 + $0xc0] sm:$0xff]  }
 0x227   : > { %2646 = vmatprep.subr.bf16.mxu0 %v4166_v27  ;;  %2810 = vmatprep.subr.bf16.mxu1 %v4169_v28  ;;  %v4244_v27 = vld [vmem:[#allocation10] sm:$0xff]  }
 0x228   : > { %v4245_v28 = vld [vmem:[#allocation10 + $0x80] sm:$0xff]  }
 0x22a   : > { %2647 = vmatpush1.bf16.msra.mxu0 %v4164_v29  ;;  %2811 = vmatpush1.bf16.msra.mxu1 %v4167_v31  ;;  %v957_v29 = vpack.c.bf16 %v949_v6, %v949_v6  ;;  %v4247_v31 = vld [vmem:[#allocation10 + $0xc8] sm:$0xff]  }
 0x22b   : > { %2648 = vmatprep.subr.bf16.mxu0 %v4172_v32  ;;  %2812 = vmatprep.subr.bf16.mxu1 %v4175_v33  ;;  %v4248_v32 = vld [vmem:[#allocation10 + $0x8] sm:$0xff]  }
 0x22c   : > { %v4249_v33 = vld [vmem:[#allocation10 + $0x88] sm:$0xff]  }
 0x22e   : > { %2649 = vmatpush1.bf16.msra.mxu0 %v4170_v34  ;;  %2813 = vmatpush1.bf16.msra.mxu1 %v4173_v35  ;;  %v4250_v34 = vld [vmem:[#allocation10 + $0x50] sm:$0xff]  }
 0x22f   : > { %2650 = vmatprep.subr.bf16.mxu0 %v4178_v36  ;;  %2814 = vmatprep.subr.bf16.mxu1 %v4181_v37  ;;  %v4251_v35 = vld [vmem:[#allocation10 + $0xd0] sm:$0xff]  }
 0x230   : > { %v4252_v36 = vld [vmem:[#allocation10 + $0x10] sm:$0xff]  }
 0x231   : > { %v4253_v37 = vld [vmem:[#allocation10 + $0x90] sm:$0xff]  }
 0x232   : > { %2651 = vmatpush1.bf16.msra.mxu0 %v4176_v38  ;;  %2815 = vmatpush1.bf16.msra.mxu1 %v4179_v39  ;;  %v4254_v38 = vld [vmem:[#allocation10 + $0x58] sm:$0xff]  }
 0x233   : > { %2652 = vmatprep.subr.bf16.mxu0 %v4184_v40  ;;  %2816 = vmatprep.subr.bf16.mxu1 %v4187_v41  ;;  %v4255_v39 = vld [vmem:[#allocation10 + $0xd8] sm:$0xff]  }
 0x234   : > { %v4256_v40 = vld [vmem:[#allocation10 + $0x18] sm:$0xff]  }
 0x235   : > { %v4257_v41 = vld [vmem:[#allocation10 + $0x98] sm:$0xff]  }
 0x236   : > { %2653 = vmatpush1.bf16.msra.mxu0 %v4182_v42  ;;  %2817 = vmatpush1.bf16.msra.mxu1 %v4185_v0  ;;  %v4258_v42 = vld [vmem:[#allocation10 + $0x60] sm:$0xff]  }
 0x237   : > { %2654 = vmatprep.subr.bf16.mxu0 %v4190_v43  ;;  %2818 = vmatprep.subr.bf16.mxu1 %v4193_v44  ;;  %v4259_v0 = vld [vmem:[#allocation10 + $0xe0] sm:$0xff]  }
 0x238   : > { %v4260_v43 = vld [vmem:[#allocation10 + $0x20] sm:$0xff]  }
 0x239   : > { %v4261_v44 = vld [vmem:[#allocation10 + $0xa0] sm:$0xff]  }
 0x23a   : > { %2655 = vmatpush1.bf16.msra.mxu0 %v4188_v45  ;;  %2819 = vmatpush1.bf16.msra.mxu1 %v4191_v46  ;;  %v4262_v45 = vld [vmem:[#allocation10 + $0x68] sm:$0xff]  }
 0x23b   : > { %2656 = vmatprep.subr.bf16.mxu0 %v4196_v47  ;;  %2820 = vmatprep.subr.bf16.mxu1 %v4199_v48  ;;  %v4263_v46 = vld [vmem:[#allocation10 + $0xe8] sm:$0xff]  }
 0x23c   : > { %v4264_v47 = vld [vmem:[#allocation10 + $0x28] sm:$0xff]  }
 0x23d   : > { %v4265_v48 = vld [vmem:[#allocation10 + $0xa8] sm:$0xff]  }
 0x23e   : > { %2657 = vmatpush1.bf16.msra.mxu0 %v4194_v49  ;;  %2821 = vmatpush1.bf16.msra.mxu1 %v4197_v50  ;;  %v4266_v49 = vld [vmem:[#allocation10 + $0x70] sm:$0xff]  }
 0x23f   : > { %2658 = vmatprep.subr.bf16.mxu0 %v4202_v51  ;;  %2822 = vmatprep.subr.bf16.mxu1 %v4205_v26  ;;  %v4267_v50 = vld [vmem:[#allocation10 + $0xf0] sm:$0xff]  }
 0x240   : > { %v4268_v51 = vld [vmem:[#allocation10 + $0x30] sm:$0xff]  }
 0x241   : > { %v4269_v26 = vld [vmem:[#allocation10 + $0xb0] sm:$0xff]  }
 0x242   : > { %2659 = vmatpush1.bf16.msra.mxu0 %v4200_v52  ;;  %2823 = vmatpush1.bf16.msra.mxu1 %v4203_v53  ;;  %v4270_v52 = vld [vmem:[#allocation10 + $0x78] sm:$0xff]  }
 0x243   : > { %2660 = vmatprep.subr.bf16.mxu0 %v4208_v54  ;;  %2824 = vmatprep.subr.bf16.mxu1 %v4211_v55  ;;  %v4271_v53 = vld [vmem:[#allocation10 + $0xf8] sm:$0xff]  }
 0x244   : > { %v4272_v54 = vld [vmem:[#allocation10 + $0x38] sm:$0xff]  }
 0x245   : > { %v4273_v55 = vld [vmem:[#allocation10 + $0xb8] sm:$0xff]  }
 0x246   : > { %2661 = vmatpush1.bf16.msra.mxu0 %v4206_v56  ;;  %2825 = vmatpush1.bf16.msra.mxu1 %v4209_v57  ;;  %v1215_v56 = vld [vmem:[%s4897_s4] sm:$0xf] }
 0x247   : > { %2662 = vmatprep.subr.bf16.mxu0 %v4214_v58  ;;  %2826 = vmatprep.subr.bf16.mxu1 %v4217_v60  ;;  %v1220_v57 = vrot.slane %v1215_v56, %v421_v9  ;;  %v1228_v58 = vrot.slane %v1215_v56, %v429_v30  ;;  %v1224_v60 = vrot.slane %v1215_v56, %v425_v11 }
 0x24a   : > { %2663 = vmatpush1.bf16.msra.mxu0 %v4212_v61  ;;  %2827 = vmatpush1.bf16.msra.mxu1 %v4215_v62  ;;  %v1232_v61 = vrot.slane %v1215_v56, %v433_v15 }
 0x24b   : > { %2664 = vmatprep.subr.bf16.mxu0 %v4220_v63  ;;  %2828 = vmatprep.subr.bf16.mxu1 %v4223_v1 }
 0x24e   : > { %2665 = vmatpush1.bf16.msra.mxu0 %v4218_v2  ;;  %2829 = vmatpush1.bf16.msra.mxu1 %v4221_v3 }
 0x24f   : > { %2666 = vmatprep.subr.bf16.mxu0 %v4226_v5  ;;  %2830 = vmatprep.subr.bf16.mxu1 %v4229_v12 }
 0x252   : > { %2667 = vmatpush1.bf16.msra.mxu0 %v4224_v13  ;;  %2831 = vmatpush1.bf16.msra.mxu1 %v4227_v59 }
 0x253   : > { %2668 = vmatprep.subr.bf16.mxu0 %v4232_v17  ;;  %2832 = vmatprep.subr.bf16.mxu1 %v4235_v18 }
 0x256   : > { %2669 = vmatpush1.bf16.msra.mxu0 %v4230_v19  ;;  %2833 = vmatpush1.bf16.msra.mxu1 %v4233_v20 }
 0x257   : > { %2670 = vmatprep.subr.bf16.mxu0 %v4238_v21  ;;  %2834 = vmatprep.subr.bf16.mxu1 %v4241_v22  ;;  %v3655_v22 = vld [vmem:[%s4899_s6] ss:$0 sm:$0xff] }
 0x25a   : > { %2671 = vmatpush1.bf16.msra.mxu0 %v4236_v23  ;;  %2835 = vmatpush1.bf16.msra.mxu1 %v4239_v24 }
 0x25b   : > { %3692 = vmatprep.subr.bf16.mxu0 %v4242_v10  ;;  %3714 = vmatprep.subr.bf16.mxu1 %v4243_v25 }
 0x25d   : > { %2673 = vmatmul.mubr.bf16.vlgmr.msra.gmra.mrb[8].mxu0 %v957_v29  ;;  %2837 = vmatmul.mubr.bf16.vlgmr.msra.gmra.mrb[8].mxu1 %v957_v29 }
 0x25e   : > { %3693 = vmatpush3.bf16.msra.mxu0 %v4244_v27  ;;  %3715 = vmatpush3.bf16.msra.mxu1 %v4245_v28 }
 0x25f   : > { %3694 = vmatprep.subr.bf16.mxu0 %v4246_v7  ;;  %3716 = vmatprep.subr.bf16.mxu1 %v4247_v31 }
 0x262   : > { %3695 = vmatpush3.bf16.msra.mxu0 %v4248_v32  ;;  %3717 = vmatpush3.bf16.msra.mxu1 %v4249_v33 }
 0x263   : > { %3696 = vmatprep.subr.bf16.mxu0 %v4250_v34  ;;  %3718 = vmatprep.subr.bf16.mxu1 %v4251_v35 }
 0x266   : > { %3697 = vmatpush3.bf16.msra.mxu0 %v4252_v36  ;;  %3719 = vmatpush3.bf16.msra.mxu1 %v4253_v37 }
 0x267   : > { %3698 = vmatprep.subr.bf16.mxu0 %v4254_v38  ;;  %3720 = vmatprep.subr.bf16.mxu1 %v4255_v39 }
 0x26a   : > { %3699 = vmatpush3.bf16.msra.mxu0 %v4256_v40  ;;  %3721 = vmatpush3.bf16.msra.mxu1 %v4257_v41 }
 0x26b   : > { %3700 = vmatprep.subr.bf16.mxu0 %v4258_v42  ;;  %3722 = vmatprep.subr.bf16.mxu1 %v4259_v0 }
 0x26e   : > { %3701 = vmatpush3.bf16.msra.mxu0 %v4260_v43  ;;  %3723 = vmatpush3.bf16.msra.mxu1 %v4261_v44 }
 0x26f   : > { %3702 = vmatprep.subr.bf16.mxu0 %v4262_v45  ;;  %3724 = vmatprep.subr.bf16.mxu1 %v4263_v46 }
 0x272   : > { %3703 = vmatpush3.bf16.msra.mxu0 %v4264_v47  ;;  %3725 = vmatpush3.bf16.msra.mxu1 %v4265_v48 }
 0x273   : > { %3704 = vmatprep.subr.bf16.mxu0 %v4266_v49  ;;  %3726 = vmatprep.subr.bf16.mxu1 %v4267_v50 }
 0x276   : > { %3705 = vmatpush3.bf16.msra.mxu0 %v4268_v51  ;;  %3727 = vmatpush3.bf16.msra.mxu1 %v4269_v26 }
 0x277   : > { %3706 = vmatprep.subr.bf16.mxu0 %v4270_v52  ;;  %3728 = vmatprep.subr.bf16.mxu1 %v4271_v53 }
 0x27a   : > { %3707 = vmatpush3.bf16.msra.mxu0 %v4272_v54  ;;  %3729 = vmatpush3.bf16.msra.mxu1 %v4273_v55 }
 0x330   : > { %v2674_v62 = vpop.f32.mrb[8].mxu0  ;;  %v2838_v63 = vpop.f32.mrb[8].mxu1 }
 0x331   : > { %v3736_v1 = vadd.f32 %v2674_v62, %v1220_v57  ;;  %v3738_v2 = vadd.f32 %v2838_v63, %v1228_v58  ;;  %v2676_v3 = vpop.f32.mrb[9].mxu0  ;;  %v2840_v4 = vpop.f32.mrb[9].mxu1 }
 0x332   : > { %v3737_v5 = vadd.f32 %v2676_v3, %v1224_v60  ;;  %v3739_v12 = vadd.f32 %v2840_v4, %v1232_v61  ;;  %v2678_v13 = vpop.f32.mrb[10].mxu0  ;;  %v2842_v59 = vpop.f32.mrb[10].mxu1 }
 0x333   : > { %v2845_v9 = vmax.f32 %v3736_v1, 0.0  ;;  %v2847_v16 = vmax.f32 %v3738_v2, 0.0  ;;  %v2679_v17 = vpop.f32.mrb[11].mxu0  ;;  %v2843_v30 = vpop.f32.mrb[11].mxu1 }
 0x334   : > { %v2846_v18 = vmax.f32 %v3737_v5, 0.0  ;;  %v2848_v19 = vmax.f32 %v3739_v12, 0.0 }
 0x335   : > { %v2849_v8 = vpack.c.bf16 %v2845_v9, %v2845_v9  ;;  %v2851_v15 = vpack.c.bf16 %v2847_v16, %v2847_v16 }
 0x336   : > { %v2850_v11 = vpack.c.bf16 %v2846_v18, %v2846_v18  ;;  %v2852_v20 = vpack.c.bf16 %v2848_v19, %v2848_v19 }
 0x338   : > { %3148 = vmatprep.mubr.bf16.mxu0 %v2850_v11  ;;  %3188 = vmatprep.mubr.bf16.mxu1 %v2852_v20 }
 0x339   : > { %3149 = vmatmul.mubr.bf16.vlgmr.msra.gmra.mrb[12].mxu0 %v2849_v8  ;;  %3189 = vmatmul.mubr.bf16.vlgmr.msra.gmra.mrb[12].mxu1 %v2851_v15 }
 0x40c   : > { %v3708_v14 = vpop.f32.mrb[12].mxu0  ;;  %v3730_v21 = vpop.f32.mrb[12].mxu1 }
 0x40d   : > { %v3709_v23 = vpop.f32.mrb[13].mxu0  ;;  %v3731_v24 = vpop.f32.mrb[13].mxu1 }
 0x40e   : > { %v3710_v6 = vadd.f32 %v3709_v23, %v3708_v14  ;;  %v3732_v10 = vadd.f32 %v3731_v24, %v3730_v21  ;;  %v3711_v25 = vpop.f32.mrb[14].mxu0  ;;  %v3733_v27 = vpop.f32.mrb[14].mxu1 }
 0x40f   : > { %v3712_v28 = vpop.f32.mrb[15].mxu0  ;;  %v3734_v29 = vpop.f32.mrb[15].mxu1 }
 0x410   : > { %v3151_v7 = vadd.f32 %v3710_v6, %v3655_v22 }
 0x412   : > { %v3191_v31 = vadd.f32 %v3732_v10, %v3151_v7 }
 0x414   : > { %3196 = vst [vmem:[%s349_s22] sm:$0xff] %v3191_v31 }
 0x415   : > { %4429 = shalt.err (!%p4426_p12)
}
 0x416   : > { %s4430_s28 = scalar_lea.hbm %s4850_s17, 128  ;;  %s4434_s21 = scalar_lea.hbm %s4900_s7, 512 }
 0x417   : > { %p4431_p13 = scmp.ne.s32.totalorder %s4850_s17, %s4430_s28  ;;  %p4435_p8 = scmp.lt.u32.totalorder %s4850_s17, %s4900_s7 }
 0x418   : > { %p4436_p9 = scmp.lt.u32.totalorder %s4434_s21, %s4430_s28  ;;  %p4438_p5 = scmp.lt.u32.totalorder %s4430_s28, %s4850_s17 }
 0x419   : > { %p4432_p1 = pnand %p4431_p13, %p4918_p0 }
 0x41a   : > { %p4437_p7 = por %p4436_p9, %p4435_p8 }
 0x41b   : > { %p4433_p6 = pneg %p4432_p1 }
 0x41c   : > { %p4439_p2 = por %p4438_p5, %p4437_p7 }
 0x41e   : > { %p4440_p4 = pnand %p4439_p2, %p4433_p6 }
 0x420   : > { %4443 = shalt.err (!%p4440_p4)
}
 0x421   : > { %3782 = dma.vmem_to_hbm [thread:$0]  (%p4918_p0), %s4852_s12, 128, %s4850_s17, %s3198_s11  }
 0x422 PF: > { %p3814_p10 = scmp.ge.s32.totalorder %s4490_s27, 2  ;;  %s3223_s20 = sand.u32 1, %s4478_s24  }
 0x423   : > { %p4919_p11 = scmp.ne.s32.totalorder %s4911_s15, 0  ;;  %s3224_s16 = scalar_lea.sflag [#allocation4], %s3223_s20 }
 0x425   : > { %p3802_p3 = pnand %p3814_p10, %p4919_p11 }
 0x427   : > { %4473 = dma.done.wait (!%p3802_p3), %s3224_s16, 128  }
 0x428   : > { %4475 = vsyncadd (!%p3802_p3), %s3224_s16, 4294967168  ;;  %p22_p12 = scmp.ge.s32.totalorder %s4680_s29, 6   ;;  %s4920_s24 = smov %s4482_s25 }
 0x429   : > { %s4921_s25 = smov %s4486_s26  ;;  %s4922_s26 = smov %s4691_s9 }
 0x42a   : > { %s4923_s27 = smov %s4680_s29  ;;  %24 = sbr.rel (!%p22_p12) target bundleno = 7 (0x7), region = 109 }
 0x431   :  { %3229 = vsyncpa [#allocation3], 1 }
 0x432   :  { %3231 = vsyncpa [#allocation3 + $0x1], 1 }
 0x433   :  { %3232 = vsyncpa [#allocation6], 1 }
 0x434   :  { %3233 = vsyncpa [#allocation9], 1 }
 0x435   :  { %3234 = vsyncpa [#allocation4], 1 }
 0x436   :  { %3236 = vsyncpa [#allocation4 + $0x1], 1 }

</bundles_post_ra>
